<compile_context>
chip_gen: v5e
topology: v5e:2x2
jax: 0.10.0
libtpu: 0.0.40
codegen_flags: <defaults>
</compile_context>

<pallas_src>
import functools

import jax
import jax.numpy as jnp
import numpy as np
from jax import lax
from jax.experimental import pallas as pl
from jax.experimental.pallas import tpu as pltpu


_FULL_UNROLL_MAX = 16


# ----------------------------------------------------------------------------
# Fused Pallas kernel: state-dependent recurrence (memory / registers / confidence)
# for exactly t_stop steps + final loss combine.
# ----------------------------------------------------------------------------
def _controller_train_kernel(abo_ref, reg_ref, mem0_ref, outmem_ref, mask_ref,
                             wg_ref, ds_ref, loss_ref, *,
                             R, t_stop, correctness_weight, confidence_weight,
                             const_term):
    out_mem = outmem_ref[...]            # (M, M)  loop invariant
    mask = mask_ref[...]                 # (M, M)  loop invariant

    def masked_sq_err(mem):              # lane reduce then sublane reduce -> (1, 1)
        d = out_mem - mem
        return jnp.sum(jnp.sum(mask * d * d, axis=1, keepdims=True),
                       axis=0, keepdims=True)

    def step(t, memory, registers, conf):
        blk = abo_ref[t]                                       # (3R, M) precomputed
        a = blk[0:R, :]
        b = blk[R:2 * R, :]
        o = blk[2 * R:3 * R, :]
        arg1 = jnp.sum(a * registers, axis=0, keepdims=True)   # (1, M) register read
        arg2 = jnp.sum(b * registers, axis=0, keepdims=True)   # (1, M)
        result = 0.5 * (arg1 + arg2)
        new_registers = registers + o * (result - registers)   # (R, M)
        wg = wg_ref[t]                                         # SMEM scalar (write gate)
        new_memory = memory + wg * (arg1 * arg2 - memory)      # (M, M)
        corr_t = masked_sq_err(new_memory)                     # (1, 1)
        new_conf = conf + ds_ref[t] * corr_t                   # SMEM scalar * (1, 1)
        return new_memory, new_registers, new_conf

    memory = mem0_ref[...]
    registers = reg_ref[...]
    conf = jnp.zeros((1, 1), jnp.float32)

    if t_stop > 0:
        if t_stop <= _FULL_UNROLL_MAX:
            for t in range(t_stop):                # fully unrolled, static slices
                memory, registers, conf = step(t, memory, registers, conf)
        else:
            def body(t, carry):
                return step(t, *carry)
            memory, registers, conf = lax.fori_loop(
                0, t_stop, body, (memory, registers, conf), unroll=4)

    corr = masked_sq_err(memory)                   # final correctness (t_stop==0 safe)
    loss_ref[...] = (jnp.float32(correctness_weight) * corr
                     + jnp.float32(confidence_weight) * conf
                     + jnp.float32(const_term))


# ----------------------------------------------------------------------------
# Controller (JAX / Pallas)
# ----------------------------------------------------------------------------
class ControllerPallas:
    def __init__(self, first_arg, second_arg, output, instruction,
                 initial_registers, ir=None, stop_threshold=0.9, multiplier=5,
                 correctness_weight=0.2, halting_weight=0.2, confidence_weight=0.2,
                 efficiency_weight=0.4, diversity_weight=0.0, t_max=75):
        R, M = initial_registers.shape
        N = instruction.shape[0]
        self.R, self.M, self.N = R, M, N
        t_max = int(t_max)
        mult = jnp.float32(multiplier)

        first_m = mult * jnp.asarray(first_arg, jnp.float32)
        second_m = mult * jnp.asarray(second_arg, jnp.float32)
        output_m = mult * jnp.asarray(output, jnp.float32)
        ins_m = mult * jnp.asarray(instruction, jnp.float32)

        if ir is None:
            ir_vec = jnp.zeros((M,), jnp.float32).at[0].set(1.0)
        else:
            ir_vec = jnp.asarray(ir, jnp.float32).reshape(M)

        # Initial register distributions (row softmax) — loop invariant.
        self.registers0 = jax.nn.softmax(
            mult * jnp.asarray(initial_registers, jnp.float32), axis=1
        ).astype(jnp.float32)

        # ---- hoisted, state-independent precompute (runs once, outside the kernel) --
        # Surrogate machine IR update is a pure roll => IR_t = roll(softmax(m*IR), t).
        ir0 = jax.nn.softmax(mult * ir_vec, axis=0)
        n_steps = max(t_max, 1)
        ir_tab = jnp.stack([jnp.roll(ir0, t) for t in range(n_steps)], axis=1)  # (M, T)

        a_all = jax.nn.softmax(first_m @ ir_tab, axis=0)     # (R, T)
        b_all = jax.nn.softmax(second_m @ ir_tab, axis=0)    # (R, T)
        o_all = jax.nn.softmax(output_m @ ir_tab, axis=0)    # (R, T)
        e_all = jax.nn.softmax(ins_m @ ir_tab, axis=0)       # (N, T)

        stop_prob = np.asarray(e_all[N - 1, :], dtype=np.float64)   # op N-1 := STOP
        write_gate = np.asarray(e_all[0, :], dtype=np.float64)      # op 0   := WRITE

        # Early-exit trajectory: mirrors `while t < t_max and stop < threshold`.
        stops = [0.0]
        t_stop = 0
        while t_stop < t_max and stops[-1] < float(stop_threshold):
            s = stops[-1]
            stops.append(float(s + stop_prob[t_stop] * (1.0 - s)))
            t_stop += 1
        self.t_stop = t_stop

        efficiency = 1.0 + sum(1.0 - stops[k + 1] for k in range(t_stop))
        halting = (1.0 - stops[t_stop]) if t_stop == t_max else 0.0
        delta_stop = [stops[k + 1] - stops[k] for k in range(t_stop)]

        if float(diversity_weight) != 0.0:
            diversity = float(jnp.sum(jnp.prod(jax.nn.softmax(ins_m, axis=0), axis=1)))
        else:
            diversity = 0.0

        const_term = (float(halting_weight) * halting
                      + float(efficiency_weight) * efficiency
                      + float(diversity_weight) * diversity)

        # Pack a/b/o for the executed steps, pre-broadcast over the M lanes.
        t_s = max(t_stop, 1)
        if t_stop > 0:
            def expand(tab):                                  # (R, T) -> (t_stop, R, M)
                cols = tab[:, :t_stop]
                return jnp.broadcast_to(cols.T[:, :, None],
                                        (t_stop, cols.shape[0], M))
            abo = jnp.concatenate([expand(a_all), expand(b_all), expand(o_all)],
                                  axis=1).astype(jnp.float32)        # (t_stop, 3R, M)
            wg_tbl = jnp.asarray(write_gate[:t_stop], jnp.float32)   # (t_stop,)
            ds_tbl = jnp.asarray(delta_stop, jnp.float32)            # (t_stop,)
        else:
            abo = jnp.zeros((1, 3 * R, M), jnp.float32)
            wg_tbl = jnp.zeros((1,), jnp.float32)
            ds_tbl = jnp.zeros((1,), jnp.float32)
        self.abo, self.wg_tbl, self.ds_tbl = abo, wg_tbl, ds_tbl

        kernel = functools.partial(
            _controller_train_kernel, R=R, t_stop=t_stop,
            correctness_weight=float(correctness_weight),
            confidence_weight=float(confidence_weight),
            const_term=float(const_term))

        cost = pl.CostEstimate(
            flops=t_stop * (6 * R * M + 6 * M * M + 4 * M) + 4 * M * M,
            transcendentals=0,
            bytes_accessed=4 * (t_s * 3 * R * M + R * M + 3 * M * M + 2 * t_s + 1))

        vmem = pl.BlockSpec(memory_space=pltpu.MemorySpace.VMEM)
        smem = pl.BlockSpec(memory_space=pltpu.MemorySpace.SMEM)
        # TODO(synk): for batched problems on v7x, add a leading "parallel" grid axis
        # over problem instances so both TensorCores are used; single instance here.
        self._fused = pl.pallas_call(
            kernel,
            out_shape=jax.ShapeDtypeStruct((1, 1), jnp.float32),
            in_specs=[vmem, vmem, vmem, vmem, vmem, smem, smem],
            out_specs=vmem,
            cost_estimate=cost,
        )

    def forward_train(self, initial_memory, output_memory, output_mask):
        out = self._fused(self.abo, self.registers0,
                          jnp.asarray(initial_memory, jnp.float32),
                          jnp.asarray(output_memory, jnp.float32),
                          jnp.asarray(output_mask, jnp.float32),
                          self.wg_tbl, self.ds_tbl)
        return out[0, 0]


# ----------------------------------------------------------------------------
if __name__ == "__main__":
    R, M, N = 4, 8, 8            # registers, memory/program size, opcode count
    T_MAX = 16
    key = jax.random.PRNGKey(0)
    ks = jax.random.split(key, 8)

    first_arg = jax.random.uniform(ks[0], (R, M), jnp.float32)
    second_arg = jax.random.uniform(ks[1], (R, M), jnp.float32)
    output_w = jax.random.uniform(ks[2], (R, M), jnp.float32)
    instruction = jax.random.uniform(ks[3], (N, M), jnp.float32)
    initial_registers = jax.random.uniform(ks[4], (R, M), jnp.float32)

    initial_memory = jax.nn.softmax(jax.random.normal(ks[5], (M, M), jnp.float32), axis=1)
    output_memory = jax.nn.softmax(jax.random.normal(ks[6], (M, M), jnp.float32), axis=1)
    output_mask = (jax.random.uniform(ks[7], (M, M), jnp.float32) > 0.5).astype(jnp.float32)

    ctrl = ControllerPallas(first_arg, second_arg, output_w, instruction,
                            initial_registers, stop_threshold=0.9, multiplier=5,
                            diversity_weight=0.0, t_max=T_MAX)

    loss = ctrl.forward_train(initial_memory, output_memory, output_mask)
    loss = jax.block_until_ready(loss)
    assert jnp.isfinite(loss), f"non-finite loss: {loss}"
    print("KERNEL_OK")
</pallas_src>

<mosaic_0001>
module attributes {stable_mosaic.version = 11 : i64} {
  func.func @_controller_train_kernel(%arg0: memref<16x12x8xf32, #tpu.memory_space<vmem>>, %arg1: memref<4x8xf32, #tpu.memory_space<vmem>>, %arg2: memref<8x8xf32, #tpu.memory_space<vmem>>, %arg3: memref<8x8xf32, #tpu.memory_space<vmem>>, %arg4: memref<8x8xf32, #tpu.memory_space<vmem>>, %arg5: memref<16xf32, #tpu.memory_space<smem>>, %arg6: memref<16xf32, #tpu.memory_space<smem>>, %arg7: memref<1x1xf32, #tpu.memory_space<vmem>>) attributes {dimension_semantics = [], scalar_prefetch = 0 : i64, scratch_operands = 0 : i64, tpu.core_type = #tpu.core_type<tc>} {
    %c0 = arith.constant 0 : index
    %c0_0 = arith.constant 0 : index
    %0 = vector.load %arg3[%c0, %c0_0] : memref<8x8xf32, #tpu.memory_space<vmem>>, vector<8x8xf32>
    %c0_1 = arith.constant 0 : index
    %c0_2 = arith.constant 0 : index
    %1 = vector.load %arg4[%c0_1, %c0_2] : memref<8x8xf32, #tpu.memory_space<vmem>>, vector<8x8xf32>
    %c0_3 = arith.constant 0 : index
    %c0_4 = arith.constant 0 : index
    %2 = vector.load %arg2[%c0_3, %c0_4] : memref<8x8xf32, #tpu.memory_space<vmem>>, vector<8x8xf32>
    %c0_5 = arith.constant 0 : index
    %c0_6 = arith.constant 0 : index
    %3 = vector.load %arg1[%c0_5, %c0_6] : memref<4x8xf32, #tpu.memory_space<vmem>>, vector<4x8xf32>
    %cst = arith.constant 0.000000e+00 : f32
    %4 = vector.broadcast %cst : f32 to vector<1x1xf32>
    %c0_7 = arith.constant 0 : index
    %c0_8 = arith.constant 0 : index
    %c0_9 = arith.constant 0 : index
    %5 = vector.load %arg0[%c0_7, %c0_8, %c0_9] : memref<16x12x8xf32, #tpu.memory_space<vmem>>, vector<1x12x8xf32>
    %6 = vector.shape_cast %5 : vector<1x12x8xf32> to vector<12x8xf32>
    %7 = vector.extract_strided_slice %6 {offsets = [0, 0], sizes = [4, 8], strides = [1, 1]} : vector<12x8xf32> to vector<4x8xf32>
    %8 = vector.extract_strided_slice %6 {offsets = [4, 0], sizes = [4, 8], strides = [1, 1]} : vector<12x8xf32> to vector<4x8xf32>
    %9 = vector.extract_strided_slice %6 {offsets = [8, 0], sizes = [4, 8], strides = [1, 1]} : vector<12x8xf32> to vector<4x8xf32>
    %10 = arith.mulf %7, %3 : vector<4x8xf32>
    %cst_10 = arith.constant dense<0.000000e+00> : vector<8xf32>
    %11 = vector.multi_reduction <add>, %10, %cst_10 [0] : vector<4x8xf32> to vector<8xf32>
    %12 = vector.shape_cast %11 : vector<8xf32> to vector<1x8xf32>
    %13 = arith.mulf %8, %3 : vector<4x8xf32>
    %cst_11 = arith.constant dense<0.000000e+00> : vector<8xf32>
    %14 = vector.multi_reduction <add>, %13, %cst_11 [0] : vector<4x8xf32> to vector<8xf32>
    %15 = vector.shape_cast %14 : vector<8xf32> to vector<1x8xf32>
    %16 = arith.addf %12, %15 : vector<1x8xf32>
    %cst_12 = arith.constant 5.000000e-01 : f32
    %17 = vector.broadcast %cst_12 : f32 to vector<1x8xf32>
    %18 = arith.mulf %17, %16 : vector<1x8xf32>
    %19 = vector.broadcast %18 : vector<1x8xf32> to vector<4x8xf32>
    %20 = arith.subf %19, %3 : vector<4x8xf32>
    %21 = arith.mulf %9, %20 : vector<4x8xf32>
    %22 = arith.addf %3, %21 : vector<4x8xf32>
    %c0_13 = arith.constant 0 : index
    %23 = memref.load %arg5[%c0_13] : memref<16xf32, #tpu.memory_space<smem>>
    %24 = arith.mulf %12, %15 : vector<1x8xf32>
    %25 = vector.broadcast %24 : vector<1x8xf32> to vector<8x8xf32>
    %26 = arith.subf %25, %2 : vector<8x8xf32>
    %27 = vector.broadcast %23 : f32 to vector<8x8xf32>
    %28 = arith.mulf %27, %26 : vector<8x8xf32>
    %29 = arith.addf %2, %28 : vector<8x8xf32>
    %30 = arith.subf %0, %29 : vector<8x8xf32>
    %31 = arith.mulf %1, %30 : vector<8x8xf32>
    %32 = arith.mulf %31, %30 : vector<8x8xf32>
    %cst_14 = arith.constant dense<0.000000e+00> : vector<8xf32>
    %33 = vector.multi_reduction <add>, %32, %cst_14 [1] : vector<8x8xf32> to vector<8xf32>
    %34 = vector.shape_cast %33 : vector<8xf32> to vector<8x1xf32>
    %cst_15 = arith.constant dense<0.000000e+00> : vector<1xf32>
    %35 = vector.multi_reduction <add>, %34, %cst_15 [0] : vector<8x1xf32> to vector<1xf32>
    %36 = vector.shape_cast %35 : vector<1xf32> to vector<1x1xf32>
    %c0_16 = arith.constant 0 : index
    %37 = memref.load %arg6[%c0_16] : memref<16xf32, #tpu.memory_space<smem>>
    %38 = vector.broadcast %37 : f32 to vector<1x1xf32>
    %39 = arith.mulf %38, %36 : vector<1x1xf32>
    %40 = arith.addf %4, %39 : vector<1x1xf32>
    %c1 = arith.constant 1 : index
    %c0_17 = arith.constant 0 : index
    %c0_18 = arith.constant 0 : index
    %41 = vector.load %arg0[%c1, %c0_17, %c0_18] : memref<16x12x8xf32, #tpu.memory_space<vmem>>, vector<1x12x8xf32>
    %42 = vector.shape_cast %41 : vector<1x12x8xf32> to vector<12x8xf32>
    %43 = vector.extract_strided_slice %42 {offsets = [0, 0], sizes = [4, 8], strides = [1, 1]} : vector<12x8xf32> to vector<4x8xf32>
    %44 = vector.extract_strided_slice %42 {offsets = [4, 0], sizes = [4, 8], strides = [1, 1]} : vector<12x8xf32> to vector<4x8xf32>
    %45 = vector.extract_strided_slice %42 {offsets = [8, 0], sizes = [4, 8], strides = [1, 1]} : vector<12x8xf32> to vector<4x8xf32>
    %46 = arith.mulf %43, %22 : vector<4x8xf32>
    %cst_19 = arith.constant dense<0.000000e+00> : vector<8xf32>
    %47 = vector.multi_reduction <add>, %46, %cst_19 [0] : vector<4x8xf32> to vector<8xf32>
    %48 = vector.shape_cast %47 : vector<8xf32> to vector<1x8xf32>
    %49 = arith.mulf %44, %22 : vector<4x8xf32>
    %cst_20 = arith.constant dense<0.000000e+00> : vector<8xf32>
    %50 = vector.multi_reduction <add>, %49, %cst_20 [0] : vector<4x8xf32> to vector<8xf32>
    %51 = vector.shape_cast %50 : vector<8xf32> to vector<1x8xf32>
    %52 = arith.addf %48, %51 : vector<1x8xf32>
    %cst_21 = arith.constant 5.000000e-01 : f32
    %53 = vector.broadcast %cst_21 : f32 to vector<1x8xf32>
    %54 = arith.mulf %53, %52 : vector<1x8xf32>
    %55 = vector.broadcast %54 : vector<1x8xf32> to vector<4x8xf32>
    %56 = arith.subf %55, %22 : vector<4x8xf32>
    %57 = arith.mulf %45, %56 : vector<4x8xf32>
    %58 = arith.addf %22, %57 : vector<4x8xf32>
    %c1_22 = arith.constant 1 : index
    %59 = memref.load %arg5[%c1_22] : memref<16xf32, #tpu.memory_space<smem>>
    %60 = arith.mulf %48, %51 : vector<1x8xf32>
    %61 = vector.broadcast %60 : vector<1x8xf32> to vector<8x8xf32>
    %62 = arith.subf %61, %29 : vector<8x8xf32>
    %63 = vector.broadcast %59 : f32 to vector<8x8xf32>
    %64 = arith.mulf %63, %62 : vector<8x8xf32>
    %65 = arith.addf %29, %64 : vector<8x8xf32>
    %66 = arith.subf %0, %65 : vector<8x8xf32>
    %67 = arith.mulf %1, %66 : vector<8x8xf32>
    %68 = arith.mulf %67, %66 : vector<8x8xf32>
    %cst_23 = arith.constant dense<0.000000e+00> : vector<8xf32>
    %69 = vector.multi_reduction <add>, %68, %cst_23 [1] : vector<8x8xf32> to vector<8xf32>
    %70 = vector.shape_cast %69 : vector<8xf32> to vector<8x1xf32>
    %cst_24 = arith.constant dense<0.000000e+00> : vector<1xf32>
    %71 = vector.multi_reduction <add>, %70, %cst_24 [0] : vector<8x1xf32> to vector<1xf32>
    %72 = vector.shape_cast %71 : vector<1xf32> to vector<1x1xf32>
    %c1_25 = arith.constant 1 : index
    %73 = memref.load %arg6[%c1_25] : memref<16xf32, #tpu.memory_space<smem>>
    %74 = vector.broadcast %73 : f32 to vector<1x1xf32>
    %75 = arith.mulf %74, %72 : vector<1x1xf32>
    %76 = arith.addf %40, %75 : vector<1x1xf32>
    %c2 = arith.constant 2 : index
    %c0_26 = arith.constant 0 : index
    %c0_27 = arith.constant 0 : index
    %77 = vector.load %arg0[%c2, %c0_26, %c0_27] : memref<16x12x8xf32, #tpu.memory_space<vmem>>, vector<1x12x8xf32>
    %78 = vector.shape_cast %77 : vector<1x12x8xf32> to vector<12x8xf32>
    %79 = vector.extract_strided_slice %78 {offsets = [0, 0], sizes = [4, 8], strides = [1, 1]} : vector<12x8xf32> to vector<4x8xf32>
    %80 = vector.extract_strided_slice %78 {offsets = [4, 0], sizes = [4, 8], strides = [1, 1]} : vector<12x8xf32> to vector<4x8xf32>
    %81 = vector.extract_strided_slice %78 {offsets = [8, 0], sizes = [4, 8], strides = [1, 1]} : vector<12x8xf32> to vector<4x8xf32>
    %82 = arith.mulf %79, %58 : vector<4x8xf32>
    %cst_28 = arith.constant dense<0.000000e+00> : vector<8xf32>
    %83 = vector.multi_reduction <add>, %82, %cst_28 [0] : vector<4x8xf32> to vector<8xf32>
    %84 = vector.shape_cast %83 : vector<8xf32> to vector<1x8xf32>
    %85 = arith.mulf %80, %58 : vector<4x8xf32>
    %cst_29 = arith.constant dense<0.000000e+00> : vector<8xf32>
    %86 = vector.multi_reduction <add>, %85, %cst_29 [0] : vector<4x8xf32> to vector<8xf32>
    %87 = vector.shape_cast %86 : vector<8xf32> to vector<1x8xf32>
    %88 = arith.addf %84, %87 : vector<1x8xf32>
    %cst_30 = arith.constant 5.000000e-01 : f32
    %89 = vector.broadcast %cst_30 : f32 to vector<1x8xf32>
    %90 = arith.mulf %89, %88 : vector<1x8xf32>
    %91 = vector.broadcast %90 : vector<1x8xf32> to vector<4x8xf32>
    %92 = arith.subf %91, %58 : vector<4x8xf32>
    %93 = arith.mulf %81, %92 : vector<4x8xf32>
    %94 = arith.addf %58, %93 : vector<4x8xf32>
    %c2_31 = arith.constant 2 : index
    %95 = memref.load %arg5[%c2_31] : memref<16xf32, #tpu.memory_space<smem>>
    %96 = arith.mulf %84, %87 : vector<1x8xf32>
    %97 = vector.broadcast %96 : vector<1x8xf32> to vector<8x8xf32>
    %98 = arith.subf %97, %65 : vector<8x8xf32>
    %99 = vector.broadcast %95 : f32 to vector<8x8xf32>
    %100 = arith.mulf %99, %98 : vector<8x8xf32>
    %101 = arith.addf %65, %100 : vector<8x8xf32>
    %102 = arith.subf %0, %101 : vector<8x8xf32>
    %103 = arith.mulf %1, %102 : vector<8x8xf32>
    %104 = arith.mulf %103, %102 : vector<8x8xf32>
    %cst_32 = arith.constant dense<0.000000e+00> : vector<8xf32>
    %105 = vector.multi_reduction <add>, %104, %cst_32 [1] : vector<8x8xf32> to vector<8xf32>
    %106 = vector.shape_cast %105 : vector<8xf32> to vector<8x1xf32>
    %cst_33 = arith.constant dense<0.000000e+00> : vector<1xf32>
    %107 = vector.multi_reduction <add>, %106, %cst_33 [0] : vector<8x1xf32> to vector<1xf32>
    %108 = vector.shape_cast %107 : vector<1xf32> to vector<1x1xf32>
    %c2_34 = arith.constant 2 : index
    %109 = memref.load %arg6[%c2_34] : memref<16xf32, #tpu.memory_space<smem>>
    %110 = vector.broadcast %109 : f32 to vector<1x1xf32>
    %111 = arith.mulf %110, %108 : vector<1x1xf32>
    %112 = arith.addf %76, %111 : vector<1x1xf32>
    %c3 = arith.constant 3 : index
    %c0_35 = arith.constant 0 : index
    %c0_36 = arith.constant 0 : index
    %113 = vector.load %arg0[%c3, %c0_35, %c0_36] : memref<16x12x8xf32, #tpu.memory_space<vmem>>, vector<1x12x8xf32>
    %114 = vector.shape_cast %113 : vector<1x12x8xf32> to vector<12x8xf32>
    %115 = vector.extract_strided_slice %114 {offsets = [0, 0], sizes = [4, 8], strides = [1, 1]} : vector<12x8xf32> to vector<4x8xf32>
    %116 = vector.extract_strided_slice %114 {offsets = [4, 0], sizes = [4, 8], strides = [1, 1]} : vector<12x8xf32> to vector<4x8xf32>
    %117 = vector.extract_strided_slice %114 {offsets = [8, 0], sizes = [4, 8], strides = [1, 1]} : vector<12x8xf32> to vector<4x8xf32>
    %118 = arith.mulf %115, %94 : vector<4x8xf32>
    %cst_37 = arith.constant dense<0.000000e+00> : vector<8xf32>
    %119 = vector.multi_reduction <add>, %118, %cst_37 [0] : vector<4x8xf32> to vector<8xf32>
    %120 = vector.shape_cast %119 : vector<8xf32> to vector<1x8xf32>
    %121 = arith.mulf %116, %94 : vector<4x8xf32>
    %cst_38 = arith.constant dense<0.000000e+00> : vector<8xf32>
    %122 = vector.multi_reduction <add>, %121, %cst_38 [0] : vector<4x8xf32> to vector<8xf32>
    %123 = vector.shape_cast %122 : vector<8xf32> to vector<1x8xf32>
    %124 = arith.addf %120, %123 : vector<1x8xf32>
    %cst_39 = arith.constant 5.000000e-01 : f32
    %125 = vector.broadcast %cst_39 : f32 to vector<1x8xf32>
    %126 = arith.mulf %125, %124 : vector<1x8xf32>
    %127 = vector.broadcast %126 : vector<1x8xf32> to vector<4x8xf32>
    %128 = arith.subf %127, %94 : vector<4x8xf32>
    %129 = arith.mulf %117, %128 : vector<4x8xf32>
    %130 = arith.addf %94, %129 : vector<4x8xf32>
    %c3_40 = arith.constant 3 : index
    %131 = memref.load %arg5[%c3_40] : memref<16xf32, #tpu.memory_space<smem>>
    %132 = arith.mulf %120, %123 : vector<1x8xf32>
    %133 = vector.broadcast %132 : vector<1x8xf32> to vector<8x8xf32>
    %134 = arith.subf %133, %101 : vector<8x8xf32>
    %135 = vector.broadcast %131 : f32 to vector<8x8xf32>
    %136 = arith.mulf %135, %134 : vector<8x8xf32>
    %137 = arith.addf %101, %136 : vector<8x8xf32>
    %138 = arith.subf %0, %137 : vector<8x8xf32>
    %139 = arith.mulf %1, %138 : vector<8x8xf32>
    %140 = arith.mulf %139, %138 : vector<8x8xf32>
    %cst_41 = arith.constant dense<0.000000e+00> : vector<8xf32>
    %141 = vector.multi_reduction <add>, %140, %cst_41 [1] : vector<8x8xf32> to vector<8xf32>
    %142 = vector.shape_cast %141 : vector<8xf32> to vector<8x1xf32>
    %cst_42 = arith.constant dense<0.000000e+00> : vector<1xf32>
    %143 = vector.multi_reduction <add>, %142, %cst_42 [0] : vector<8x1xf32> to vector<1xf32>
    %144 = vector.shape_cast %143 : vector<1xf32> to vector<1x1xf32>
    %c3_43 = arith.constant 3 : index
    %145 = memref.load %arg6[%c3_43] : memref<16xf32, #tpu.memory_space<smem>>
    %146 = vector.broadcast %145 : f32 to vector<1x1xf32>
    %147 = arith.mulf %146, %144 : vector<1x1xf32>
    %148 = arith.addf %112, %147 : vector<1x1xf32>
    %c4 = arith.constant 4 : index
    %c0_44 = arith.constant 0 : index
    %c0_45 = arith.constant 0 : index
    %149 = vector.load %arg0[%c4, %c0_44, %c0_45] : memref<16x12x8xf32, #tpu.memory_space<vmem>>, vector<1x12x8xf32>
    %150 = vector.shape_cast %149 : vector<1x12x8xf32> to vector<12x8xf32>
    %151 = vector.extract_strided_slice %150 {offsets = [0, 0], sizes = [4, 8], strides = [1, 1]} : vector<12x8xf32> to vector<4x8xf32>
    %152 = vector.extract_strided_slice %150 {offsets = [4, 0], sizes = [4, 8], strides = [1, 1]} : vector<12x8xf32> to vector<4x8xf32>
    %153 = vector.extract_strided_slice %150 {offsets = [8, 0], sizes = [4, 8], strides = [1, 1]} : vector<12x8xf32> to vector<4x8xf32>
    %154 = arith.mulf %151, %130 : vector<4x8xf32>
    %cst_46 = arith.constant dense<0.000000e+00> : vector<8xf32>
    %155 = vector.multi_reduction <add>, %154, %cst_46 [0] : vector<4x8xf32> to vector<8xf32>
    %156 = vector.shape_cast %155 : vector<8xf32> to vector<1x8xf32>
    %157 = arith.mulf %152, %130 : vector<4x8xf32>
    %cst_47 = arith.constant dense<0.000000e+00> : vector<8xf32>
    %158 = vector.multi_reduction <add>, %157, %cst_47 [0] : vector<4x8xf32> to vector<8xf32>
    %159 = vector.shape_cast %158 : vector<8xf32> to vector<1x8xf32>
    %160 = arith.addf %156, %159 : vector<1x8xf32>
    %cst_48 = arith.constant 5.000000e-01 : f32
    %161 = vector.broadcast %cst_48 : f32 to vector<1x8xf32>
    %162 = arith.mulf %161, %160 : vector<1x8xf32>
    %163 = vector.broadcast %162 : vector<1x8xf32> to vector<4x8xf32>
    %164 = arith.subf %163, %130 : vector<4x8xf32>
    %165 = arith.mulf %153, %164 : vector<4x8xf32>
    %166 = arith.addf %130, %165 : vector<4x8xf32>
    %c4_49 = arith.constant 4 : index
    %167 = memref.load %arg5[%c4_49] : memref<16xf32, #tpu.memory_space<smem>>
    %168 = arith.mulf %156, %159 : vector<1x8xf32>
    %169 = vector.broadcast %168 : vector<1x8xf32> to vector<8x8xf32>
    %170 = arith.subf %169, %137 : vector<8x8xf32>
    %171 = vector.broadcast %167 : f32 to vector<8x8xf32>
    %172 = arith.mulf %171, %170 : vector<8x8xf32>
    %173 = arith.addf %137, %172 : vector<8x8xf32>
    %174 = arith.subf %0, %173 : vector<8x8xf32>
    %175 = arith.mulf %1, %174 : vector<8x8xf32>
    %176 = arith.mulf %175, %174 : vector<8x8xf32>
    %cst_50 = arith.constant dense<0.000000e+00> : vector<8xf32>
    %177 = vector.multi_reduction <add>, %176, %cst_50 [1] : vector<8x8xf32> to vector<8xf32>
    %178 = vector.shape_cast %177 : vector<8xf32> to vector<8x1xf32>
    %cst_51 = arith.constant dense<0.000000e+00> : vector<1xf32>
    %179 = vector.multi_reduction <add>, %178, %cst_51 [0] : vector<8x1xf32> to vector<1xf32>
    %180 = vector.shape_cast %179 : vector<1xf32> to vector<1x1xf32>
    %c4_52 = arith.constant 4 : index
    %181 = memref.load %arg6[%c4_52] : memref<16xf32, #tpu.memory_space<smem>>
    %182 = vector.broadcast %181 : f32 to vector<1x1xf32>
    %183 = arith.mulf %182, %180 : vector<1x1xf32>
    %184 = arith.addf %148, %183 : vector<1x1xf32>
    %c5 = arith.constant 5 : index
    %c0_53 = arith.constant 0 : index
    %c0_54 = arith.constant 0 : index
    %185 = vector.load %arg0[%c5, %c0_53, %c0_54] : memref<16x12x8xf32, #tpu.memory_space<vmem>>, vector<1x12x8xf32>
    %186 = vector.shape_cast %185 : vector<1x12x8xf32> to vector<12x8xf32>
    %187 = vector.extract_strided_slice %186 {offsets = [0, 0], sizes = [4, 8], strides = [1, 1]} : vector<12x8xf32> to vector<4x8xf32>
    %188 = vector.extract_strided_slice %186 {offsets = [4, 0], sizes = [4, 8], strides = [1, 1]} : vector<12x8xf32> to vector<4x8xf32>
    %189 = vector.extract_strided_slice %186 {offsets = [8, 0], sizes = [4, 8], strides = [1, 1]} : vector<12x8xf32> to vector<4x8xf32>
    %190 = arith.mulf %187, %166 : vector<4x8xf32>
    %cst_55 = arith.constant dense<0.000000e+00> : vector<8xf32>
    %191 = vector.multi_reduction <add>, %190, %cst_55 [0] : vector<4x8xf32> to vector<8xf32>
    %192 = vector.shape_cast %191 : vector<8xf32> to vector<1x8xf32>
    %193 = arith.mulf %188, %166 : vector<4x8xf32>
    %cst_56 = arith.constant dense<0.000000e+00> : vector<8xf32>
    %194 = vector.multi_reduction <add>, %193, %cst_56 [0] : vector<4x8xf32> to vector<8xf32>
    %195 = vector.shape_cast %194 : vector<8xf32> to vector<1x8xf32>
    %196 = arith.addf %192, %195 : vector<1x8xf32>
    %cst_57 = arith.constant 5.000000e-01 : f32
    %197 = vector.broadcast %cst_57 : f32 to vector<1x8xf32>
    %198 = arith.mulf %197, %196 : vector<1x8xf32>
    %199 = vector.broadcast %198 : vector<1x8xf32> to vector<4x8xf32>
    %200 = arith.subf %199, %166 : vector<4x8xf32>
    %201 = arith.mulf %189, %200 : vector<4x8xf32>
    %202 = arith.addf %166, %201 : vector<4x8xf32>
    %c5_58 = arith.constant 5 : index
    %203 = memref.load %arg5[%c5_58] : memref<16xf32, #tpu.memory_space<smem>>
    %204 = arith.mulf %192, %195 : vector<1x8xf32>
    %205 = vector.broadcast %204 : vector<1x8xf32> to vector<8x8xf32>
    %206 = arith.subf %205, %173 : vector<8x8xf32>
    %207 = vector.broadcast %203 : f32 to vector<8x8xf32>
    %208 = arith.mulf %207, %206 : vector<8x8xf32>
    %209 = arith.addf %173, %208 : vector<8x8xf32>
    %210 = arith.subf %0, %209 : vector<8x8xf32>
    %211 = arith.mulf %1, %210 : vector<8x8xf32>
    %212 = arith.mulf %211, %210 : vector<8x8xf32>
    %cst_59 = arith.constant dense<0.000000e+00> : vector<8xf32>
    %213 = vector.multi_reduction <add>, %212, %cst_59 [1] : vector<8x8xf32> to vector<8xf32>
    %214 = vector.shape_cast %213 : vector<8xf32> to vector<8x1xf32>
    %cst_60 = arith.constant dense<0.000000e+00> : vector<1xf32>
    %215 = vector.multi_reduction <add>, %214, %cst_60 [0] : vector<8x1xf32> to vector<1xf32>
    %216 = vector.shape_cast %215 : vector<1xf32> to vector<1x1xf32>
    %c5_61 = arith.constant 5 : index
    %217 = memref.load %arg6[%c5_61] : memref<16xf32, #tpu.memory_space<smem>>
    %218 = vector.broadcast %217 : f32 to vector<1x1xf32>
    %219 = arith.mulf %218, %216 : vector<1x1xf32>
    %220 = arith.addf %184, %219 : vector<1x1xf32>
    %c6 = arith.constant 6 : index
    %c0_62 = arith.constant 0 : index
    %c0_63 = arith.constant 0 : index
    %221 = vector.load %arg0[%c6, %c0_62, %c0_63] : memref<16x12x8xf32, #tpu.memory_space<vmem>>, vector<1x12x8xf32>
    %222 = vector.shape_cast %221 : vector<1x12x8xf32> to vector<12x8xf32>
    %223 = vector.extract_strided_slice %222 {offsets = [0, 0], sizes = [4, 8], strides = [1, 1]} : vector<12x8xf32> to vector<4x8xf32>
    %224 = vector.extract_strided_slice %222 {offsets = [4, 0], sizes = [4, 8], strides = [1, 1]} : vector<12x8xf32> to vector<4x8xf32>
    %225 = vector.extract_strided_slice %222 {offsets = [8, 0], sizes = [4, 8], strides = [1, 1]} : vector<12x8xf32> to vector<4x8xf32>
    %226 = arith.mulf %223, %202 : vector<4x8xf32>
    %cst_64 = arith.constant dense<0.000000e+00> : vector<8xf32>
    %227 = vector.multi_reduction <add>, %226, %cst_64 [0] : vector<4x8xf32> to vector<8xf32>
    %228 = vector.shape_cast %227 : vector<8xf32> to vector<1x8xf32>
    %229 = arith.mulf %224, %202 : vector<4x8xf32>
    %cst_65 = arith.constant dense<0.000000e+00> : vector<8xf32>
    %230 = vector.multi_reduction <add>, %229, %cst_65 [0] : vector<4x8xf32> to vector<8xf32>
    %231 = vector.shape_cast %230 : vector<8xf32> to vector<1x8xf32>
    %232 = arith.addf %228, %231 : vector<1x8xf32>
    %cst_66 = arith.constant 5.000000e-01 : f32
    %233 = vector.broadcast %cst_66 : f32 to vector<1x8xf32>
    %234 = arith.mulf %233, %232 : vector<1x8xf32>
    %235 = vector.broadcast %234 : vector<1x8xf32> to vector<4x8xf32>
    %236 = arith.subf %235, %202 : vector<4x8xf32>
    %237 = arith.mulf %225, %236 : vector<4x8xf32>
    %238 = arith.addf %202, %237 : vector<4x8xf32>
    %c6_67 = arith.constant 6 : index
    %239 = memref.load %arg5[%c6_67] : memref<16xf32, #tpu.memory_space<smem>>
    %240 = arith.mulf %228, %231 : vector<1x8xf32>
    %241 = vector.broadcast %240 : vector<1x8xf32> to vector<8x8xf32>
    %242 = arith.subf %241, %209 : vector<8x8xf32>
    %243 = vector.broadcast %239 : f32 to vector<8x8xf32>
    %244 = arith.mulf %243, %242 : vector<8x8xf32>
    %245 = arith.addf %209, %244 : vector<8x8xf32>
    %246 = arith.subf %0, %245 : vector<8x8xf32>
    %247 = arith.mulf %1, %246 : vector<8x8xf32>
    %248 = arith.mulf %247, %246 : vector<8x8xf32>
    %cst_68 = arith.constant dense<0.000000e+00> : vector<8xf32>
    %249 = vector.multi_reduction <add>, %248, %cst_68 [1] : vector<8x8xf32> to vector<8xf32>
    %250 = vector.shape_cast %249 : vector<8xf32> to vector<8x1xf32>
    %cst_69 = arith.constant dense<0.000000e+00> : vector<1xf32>
    %251 = vector.multi_reduction <add>, %250, %cst_69 [0] : vector<8x1xf32> to vector<1xf32>
    %252 = vector.shape_cast %251 : vector<1xf32> to vector<1x1xf32>
    %c6_70 = arith.constant 6 : index
    %253 = memref.load %arg6[%c6_70] : memref<16xf32, #tpu.memory_space<smem>>
    %254 = vector.broadcast %253 : f32 to vector<1x1xf32>
    %255 = arith.mulf %254, %252 : vector<1x1xf32>
    %256 = arith.addf %220, %255 : vector<1x1xf32>
    %c7 = arith.constant 7 : index
    %c0_71 = arith.constant 0 : index
    %c0_72 = arith.constant 0 : index
    %257 = vector.load %arg0[%c7, %c0_71, %c0_72] : memref<16x12x8xf32, #tpu.memory_space<vmem>>, vector<1x12x8xf32>
    %258 = vector.shape_cast %257 : vector<1x12x8xf32> to vector<12x8xf32>
    %259 = vector.extract_strided_slice %258 {offsets = [0, 0], sizes = [4, 8], strides = [1, 1]} : vector<12x8xf32> to vector<4x8xf32>
    %260 = vector.extract_strided_slice %258 {offsets = [4, 0], sizes = [4, 8], strides = [1, 1]} : vector<12x8xf32> to vector<4x8xf32>
    %261 = vector.extract_strided_slice %258 {offsets = [8, 0], sizes = [4, 8], strides = [1, 1]} : vector<12x8xf32> to vector<4x8xf32>
    %262 = arith.mulf %259, %238 : vector<4x8xf32>
    %cst_73 = arith.constant dense<0.000000e+00> : vector<8xf32>
    %263 = vector.multi_reduction <add>, %262, %cst_73 [0] : vector<4x8xf32> to vector<8xf32>
    %264 = vector.shape_cast %263 : vector<8xf32> to vector<1x8xf32>
    %265 = arith.mulf %260, %238 : vector<4x8xf32>
    %cst_74 = arith.constant dense<0.000000e+00> : vector<8xf32>
    %266 = vector.multi_reduction <add>, %265, %cst_74 [0] : vector<4x8xf32> to vector<8xf32>
    %267 = vector.shape_cast %266 : vector<8xf32> to vector<1x8xf32>
    %268 = arith.addf %264, %267 : vector<1x8xf32>
    %cst_75 = arith.constant 5.000000e-01 : f32
    %269 = vector.broadcast %cst_75 : f32 to vector<1x8xf32>
    %270 = arith.mulf %269, %268 : vector<1x8xf32>
    %271 = vector.broadcast %270 : vector<1x8xf32> to vector<4x8xf32>
    %272 = arith.subf %271, %238 : vector<4x8xf32>
    %273 = arith.mulf %261, %272 : vector<4x8xf32>
    %274 = arith.addf %238, %273 : vector<4x8xf32>
    %c7_76 = arith.constant 7 : index
    %275 = memref.load %arg5[%c7_76] : memref<16xf32, #tpu.memory_space<smem>>
    %276 = arith.mulf %264, %267 : vector<1x8xf32>
    %277 = vector.broadcast %276 : vector<1x8xf32> to vector<8x8xf32>
    %278 = arith.subf %277, %245 : vector<8x8xf32>
    %279 = vector.broadcast %275 : f32 to vector<8x8xf32>
    %280 = arith.mulf %279, %278 : vector<8x8xf32>
    %281 = arith.addf %245, %280 : vector<8x8xf32>
    %282 = arith.subf %0, %281 : vector<8x8xf32>
    %283 = arith.mulf %1, %282 : vector<8x8xf32>
    %284 = arith.mulf %283, %282 : vector<8x8xf32>
    %cst_77 = arith.constant dense<0.000000e+00> : vector<8xf32>
    %285 = vector.multi_reduction <add>, %284, %cst_77 [1] : vector<8x8xf32> to vector<8xf32>
    %286 = vector.shape_cast %285 : vector<8xf32> to vector<8x1xf32>
    %cst_78 = arith.constant dense<0.000000e+00> : vector<1xf32>
    %287 = vector.multi_reduction <add>, %286, %cst_78 [0] : vector<8x1xf32> to vector<1xf32>
    %288 = vector.shape_cast %287 : vector<1xf32> to vector<1x1xf32>
    %c7_79 = arith.constant 7 : index
    %289 = memref.load %arg6[%c7_79] : memref<16xf32, #tpu.memory_space<smem>>
    %290 = vector.broadcast %289 : f32 to vector<1x1xf32>
    %291 = arith.mulf %290, %288 : vector<1x1xf32>
    %292 = arith.addf %256, %291 : vector<1x1xf32>
    %c8 = arith.constant 8 : index
    %c0_80 = arith.constant 0 : index
    %c0_81 = arith.constant 0 : index
    %293 = vector.load %arg0[%c8, %c0_80, %c0_81] : memref<16x12x8xf32, #tpu.memory_space<vmem>>, vector<1x12x8xf32>
    %294 = vector.shape_cast %293 : vector<1x12x8xf32> to vector<12x8xf32>
    %295 = vector.extract_strided_slice %294 {offsets = [0, 0], sizes = [4, 8], strides = [1, 1]} : vector<12x8xf32> to vector<4x8xf32>
    %296 = vector.extract_strided_slice %294 {offsets = [4, 0], sizes = [4, 8], strides = [1, 1]} : vector<12x8xf32> to vector<4x8xf32>
    %297 = vector.extract_strided_slice %294 {offsets = [8, 0], sizes = [4, 8], strides = [1, 1]} : vector<12x8xf32> to vector<4x8xf32>
    %298 = arith.mulf %295, %274 : vector<4x8xf32>
    %cst_82 = arith.constant dense<0.000000e+00> : vector<8xf32>
    %299 = vector.multi_reduction <add>, %298, %cst_82 [0] : vector<4x8xf32> to vector<8xf32>
    %300 = vector.shape_cast %299 : vector<8xf32> to vector<1x8xf32>
    %301 = arith.mulf %296, %274 : vector<4x8xf32>
    %cst_83 = arith.constant dense<0.000000e+00> : vector<8xf32>
    %302 = vector.multi_reduction <add>, %301, %cst_83 [0] : vector<4x8xf32> to vector<8xf32>
    %303 = vector.shape_cast %302 : vector<8xf32> to vector<1x8xf32>
    %304 = arith.addf %300, %303 : vector<1x8xf32>
    %cst_84 = arith.constant 5.000000e-01 : f32
    %305 = vector.broadcast %cst_84 : f32 to vector<1x8xf32>
    %306 = arith.mulf %305, %304 : vector<1x8xf32>
    %307 = vector.broadcast %306 : vector<1x8xf32> to vector<4x8xf32>
    %308 = arith.subf %307, %274 : vector<4x8xf32>
    %309 = arith.mulf %297, %308 : vector<4x8xf32>
    %310 = arith.addf %274, %309 : vector<4x8xf32>
    %c8_85 = arith.constant 8 : index
    %311 = memref.load %arg5[%c8_85] : memref<16xf32, #tpu.memory_space<smem>>
    %312 = arith.mulf %300, %303 : vector<1x8xf32>
    %313 = vector.broadcast %312 : vector<1x8xf32> to vector<8x8xf32>
    %314 = arith.subf %313, %281 : vector<8x8xf32>
    %315 = vector.broadcast %311 : f32 to vector<8x8xf32>
    %316 = arith.mulf %315, %314 : vector<8x8xf32>
    %317 = arith.addf %281, %316 : vector<8x8xf32>
    %318 = arith.subf %0, %317 : vector<8x8xf32>
    %319 = arith.mulf %1, %318 : vector<8x8xf32>
    %320 = arith.mulf %319, %318 : vector<8x8xf32>
    %cst_86 = arith.constant dense<0.000000e+00> : vector<8xf32>
    %321 = vector.multi_reduction <add>, %320, %cst_86 [1] : vector<8x8xf32> to vector<8xf32>
    %322 = vector.shape_cast %321 : vector<8xf32> to vector<8x1xf32>
    %cst_87 = arith.constant dense<0.000000e+00> : vector<1xf32>
    %323 = vector.multi_reduction <add>, %322, %cst_87 [0] : vector<8x1xf32> to vector<1xf32>
    %324 = vector.shape_cast %323 : vector<1xf32> to vector<1x1xf32>
    %c8_88 = arith.constant 8 : index
    %325 = memref.load %arg6[%c8_88] : memref<16xf32, #tpu.memory_space<smem>>
    %326 = vector.broadcast %325 : f32 to vector<1x1xf32>
    %327 = arith.mulf %326, %324 : vector<1x1xf32>
    %328 = arith.addf %292, %327 : vector<1x1xf32>
    %c9 = arith.constant 9 : index
    %c0_89 = arith.constant 0 : index
    %c0_90 = arith.constant 0 : index
    %329 = vector.load %arg0[%c9, %c0_89, %c0_90] : memref<16x12x8xf32, #tpu.memory_space<vmem>>, vector<1x12x8xf32>
    %330 = vector.shape_cast %329 : vector<1x12x8xf32> to vector<12x8xf32>
    %331 = vector.extract_strided_slice %330 {offsets = [0, 0], sizes = [4, 8], strides = [1, 1]} : vector<12x8xf32> to vector<4x8xf32>
    %332 = vector.extract_strided_slice %330 {offsets = [4, 0], sizes = [4, 8], strides = [1, 1]} : vector<12x8xf32> to vector<4x8xf32>
    %333 = vector.extract_strided_slice %330 {offsets = [8, 0], sizes = [4, 8], strides = [1, 1]} : vector<12x8xf32> to vector<4x8xf32>
    %334 = arith.mulf %331, %310 : vector<4x8xf32>
    %cst_91 = arith.constant dense<0.000000e+00> : vector<8xf32>
    %335 = vector.multi_reduction <add>, %334, %cst_91 [0] : vector<4x8xf32> to vector<8xf32>
    %336 = vector.shape_cast %335 : vector<8xf32> to vector<1x8xf32>
    %337 = arith.mulf %332, %310 : vector<4x8xf32>
    %cst_92 = arith.constant dense<0.000000e+00> : vector<8xf32>
    %338 = vector.multi_reduction <add>, %337, %cst_92 [0] : vector<4x8xf32> to vector<8xf32>
    %339 = vector.shape_cast %338 : vector<8xf32> to vector<1x8xf32>
    %340 = arith.addf %336, %339 : vector<1x8xf32>
    %cst_93 = arith.constant 5.000000e-01 : f32
    %341 = vector.broadcast %cst_93 : f32 to vector<1x8xf32>
    %342 = arith.mulf %341, %340 : vector<1x8xf32>
    %343 = vector.broadcast %342 : vector<1x8xf32> to vector<4x8xf32>
    %344 = arith.subf %343, %310 : vector<4x8xf32>
    %345 = arith.mulf %333, %344 : vector<4x8xf32>
    %346 = arith.addf %310, %345 : vector<4x8xf32>
    %c9_94 = arith.constant 9 : index
    %347 = memref.load %arg5[%c9_94] : memref<16xf32, #tpu.memory_space<smem>>
    %348 = arith.mulf %336, %339 : vector<1x8xf32>
    %349 = vector.broadcast %348 : vector<1x8xf32> to vector<8x8xf32>
    %350 = arith.subf %349, %317 : vector<8x8xf32>
    %351 = vector.broadcast %347 : f32 to vector<8x8xf32>
    %352 = arith.mulf %351, %350 : vector<8x8xf32>
    %353 = arith.addf %317, %352 : vector<8x8xf32>
    %354 = arith.subf %0, %353 : vector<8x8xf32>
    %355 = arith.mulf %1, %354 : vector<8x8xf32>
    %356 = arith.mulf %355, %354 : vector<8x8xf32>
    %cst_95 = arith.constant dense<0.000000e+00> : vector<8xf32>
    %357 = vector.multi_reduction <add>, %356, %cst_95 [1] : vector<8x8xf32> to vector<8xf32>
    %358 = vector.shape_cast %357 : vector<8xf32> to vector<8x1xf32>
    %cst_96 = arith.constant dense<0.000000e+00> : vector<1xf32>
    %359 = vector.multi_reduction <add>, %358, %cst_96 [0] : vector<8x1xf32> to vector<1xf32>
    %360 = vector.shape_cast %359 : vector<1xf32> to vector<1x1xf32>
    %c9_97 = arith.constant 9 : index
    %361 = memref.load %arg6[%c9_97] : memref<16xf32, #tpu.memory_space<smem>>
    %362 = vector.broadcast %361 : f32 to vector<1x1xf32>
    %363 = arith.mulf %362, %360 : vector<1x1xf32>
    %364 = arith.addf %328, %363 : vector<1x1xf32>
    %c10 = arith.constant 10 : index
    %c0_98 = arith.constant 0 : index
    %c0_99 = arith.constant 0 : index
    %365 = vector.load %arg0[%c10, %c0_98, %c0_99] : memref<16x12x8xf32, #tpu.memory_space<vmem>>, vector<1x12x8xf32>
    %366 = vector.shape_cast %365 : vector<1x12x8xf32> to vector<12x8xf32>
    %367 = vector.extract_strided_slice %366 {offsets = [0, 0], sizes = [4, 8], strides = [1, 1]} : vector<12x8xf32> to vector<4x8xf32>
    %368 = vector.extract_strided_slice %366 {offsets = [4, 0], sizes = [4, 8], strides = [1, 1]} : vector<12x8xf32> to vector<4x8xf32>
    %369 = vector.extract_strided_slice %366 {offsets = [8, 0], sizes = [4, 8], strides = [1, 1]} : vector<12x8xf32> to vector<4x8xf32>
    %370 = arith.mulf %367, %346 : vector<4x8xf32>
    %cst_100 = arith.constant dense<0.000000e+00> : vector<8xf32>
    %371 = vector.multi_reduction <add>, %370, %cst_100 [0] : vector<4x8xf32> to vector<8xf32>
    %372 = vector.shape_cast %371 : vector<8xf32> to vector<1x8xf32>
    %373 = arith.mulf %368, %346 : vector<4x8xf32>
    %cst_101 = arith.constant dense<0.000000e+00> : vector<8xf32>
    %374 = vector.multi_reduction <add>, %373, %cst_101 [0] : vector<4x8xf32> to vector<8xf32>
    %375 = vector.shape_cast %374 : vector<8xf32> to vector<1x8xf32>
    %376 = arith.addf %372, %375 : vector<1x8xf32>
    %cst_102 = arith.constant 5.000000e-01 : f32
    %377 = vector.broadcast %cst_102 : f32 to vector<1x8xf32>
    %378 = arith.mulf %377, %376 : vector<1x8xf32>
    %379 = vector.broadcast %378 : vector<1x8xf32> to vector<4x8xf32>
    %380 = arith.subf %379, %346 : vector<4x8xf32>
    %381 = arith.mulf %369, %380 : vector<4x8xf32>
    %382 = arith.addf %346, %381 : vector<4x8xf32>
    %c10_103 = arith.constant 10 : index
    %383 = memref.load %arg5[%c10_103] : memref<16xf32, #tpu.memory_space<smem>>
    %384 = arith.mulf %372, %375 : vector<1x8xf32>
    %385 = vector.broadcast %384 : vector<1x8xf32> to vector<8x8xf32>
    %386 = arith.subf %385, %353 : vector<8x8xf32>
    %387 = vector.broadcast %383 : f32 to vector<8x8xf32>
    %388 = arith.mulf %387, %386 : vector<8x8xf32>
    %389 = arith.addf %353, %388 : vector<8x8xf32>
    %390 = arith.subf %0, %389 : vector<8x8xf32>
    %391 = arith.mulf %1, %390 : vector<8x8xf32>
    %392 = arith.mulf %391, %390 : vector<8x8xf32>
    %cst_104 = arith.constant dense<0.000000e+00> : vector<8xf32>
    %393 = vector.multi_reduction <add>, %392, %cst_104 [1] : vector<8x8xf32> to vector<8xf32>
    %394 = vector.shape_cast %393 : vector<8xf32> to vector<8x1xf32>
    %cst_105 = arith.constant dense<0.000000e+00> : vector<1xf32>
    %395 = vector.multi_reduction <add>, %394, %cst_105 [0] : vector<8x1xf32> to vector<1xf32>
    %396 = vector.shape_cast %395 : vector<1xf32> to vector<1x1xf32>
    %c10_106 = arith.constant 10 : index
    %397 = memref.load %arg6[%c10_106] : memref<16xf32, #tpu.memory_space<smem>>
    %398 = vector.broadcast %397 : f32 to vector<1x1xf32>
    %399 = arith.mulf %398, %396 : vector<1x1xf32>
    %400 = arith.addf %364, %399 : vector<1x1xf32>
    %c11 = arith.constant 11 : index
    %c0_107 = arith.constant 0 : index
    %c0_108 = arith.constant 0 : index
    %401 = vector.load %arg0[%c11, %c0_107, %c0_108] : memref<16x12x8xf32, #tpu.memory_space<vmem>>, vector<1x12x8xf32>
    %402 = vector.shape_cast %401 : vector<1x12x8xf32> to vector<12x8xf32>
    %403 = vector.extract_strided_slice %402 {offsets = [0, 0], sizes = [4, 8], strides = [1, 1]} : vector<12x8xf32> to vector<4x8xf32>
    %404 = vector.extract_strided_slice %402 {offsets = [4, 0], sizes = [4, 8], strides = [1, 1]} : vector<12x8xf32> to vector<4x8xf32>
    %405 = vector.extract_strided_slice %402 {offsets = [8, 0], sizes = [4, 8], strides = [1, 1]} : vector<12x8xf32> to vector<4x8xf32>
    %406 = arith.mulf %403, %382 : vector<4x8xf32>
    %cst_109 = arith.constant dense<0.000000e+00> : vector<8xf32>
    %407 = vector.multi_reduction <add>, %406, %cst_109 [0] : vector<4x8xf32> to vector<8xf32>
    %408 = vector.shape_cast %407 : vector<8xf32> to vector<1x8xf32>
    %409 = arith.mulf %404, %382 : vector<4x8xf32>
    %cst_110 = arith.constant dense<0.000000e+00> : vector<8xf32>
    %410 = vector.multi_reduction <add>, %409, %cst_110 [0] : vector<4x8xf32> to vector<8xf32>
    %411 = vector.shape_cast %410 : vector<8xf32> to vector<1x8xf32>
    %412 = arith.addf %408, %411 : vector<1x8xf32>
    %cst_111 = arith.constant 5.000000e-01 : f32
    %413 = vector.broadcast %cst_111 : f32 to vector<1x8xf32>
    %414 = arith.mulf %413, %412 : vector<1x8xf32>
    %415 = vector.broadcast %414 : vector<1x8xf32> to vector<4x8xf32>
    %416 = arith.subf %415, %382 : vector<4x8xf32>
    %417 = arith.mulf %405, %416 : vector<4x8xf32>
    %418 = arith.addf %382, %417 : vector<4x8xf32>
    %c11_112 = arith.constant 11 : index
    %419 = memref.load %arg5[%c11_112] : memref<16xf32, #tpu.memory_space<smem>>
    %420 = arith.mulf %408, %411 : vector<1x8xf32>
    %421 = vector.broadcast %420 : vector<1x8xf32> to vector<8x8xf32>
    %422 = arith.subf %421, %389 : vector<8x8xf32>
    %423 = vector.broadcast %419 : f32 to vector<8x8xf32>
    %424 = arith.mulf %423, %422 : vector<8x8xf32>
    %425 = arith.addf %389, %424 : vector<8x8xf32>
    %426 = arith.subf %0, %425 : vector<8x8xf32>
    %427 = arith.mulf %1, %426 : vector<8x8xf32>
    %428 = arith.mulf %427, %426 : vector<8x8xf32>
    %cst_113 = arith.constant dense<0.000000e+00> : vector<8xf32>
    %429 = vector.multi_reduction <add>, %428, %cst_113 [1] : vector<8x8xf32> to vector<8xf32>
    %430 = vector.shape_cast %429 : vector<8xf32> to vector<8x1xf32>
    %cst_114 = arith.constant dense<0.000000e+00> : vector<1xf32>
    %431 = vector.multi_reduction <add>, %430, %cst_114 [0] : vector<8x1xf32> to vector<1xf32>
    %432 = vector.shape_cast %431 : vector<1xf32> to vector<1x1xf32>
    %c11_115 = arith.constant 11 : index
    %433 = memref.load %arg6[%c11_115] : memref<16xf32, #tpu.memory_space<smem>>
    %434 = vector.broadcast %433 : f32 to vector<1x1xf32>
    %435 = arith.mulf %434, %432 : vector<1x1xf32>
    %436 = arith.addf %400, %435 : vector<1x1xf32>
    %c12 = arith.constant 12 : index
    %c0_116 = arith.constant 0 : index
    %c0_117 = arith.constant 0 : index
    %437 = vector.load %arg0[%c12, %c0_116, %c0_117] : memref<16x12x8xf32, #tpu.memory_space<vmem>>, vector<1x12x8xf32>
    %438 = vector.shape_cast %437 : vector<1x12x8xf32> to vector<12x8xf32>
    %439 = vector.extract_strided_slice %438 {offsets = [0, 0], sizes = [4, 8], strides = [1, 1]} : vector<12x8xf32> to vector<4x8xf32>
    %440 = vector.extract_strided_slice %438 {offsets = [4, 0], sizes = [4, 8], strides = [1, 1]} : vector<12x8xf32> to vector<4x8xf32>
    %441 = vector.extract_strided_slice %438 {offsets = [8, 0], sizes = [4, 8], strides = [1, 1]} : vector<12x8xf32> to vector<4x8xf32>
    %442 = arith.mulf %439, %418 : vector<4x8xf32>
    %cst_118 = arith.constant dense<0.000000e+00> : vector<8xf32>
    %443 = vector.multi_reduction <add>, %442, %cst_118 [0] : vector<4x8xf32> to vector<8xf32>
    %444 = vector.shape_cast %443 : vector<8xf32> to vector<1x8xf32>
    %445 = arith.mulf %440, %418 : vector<4x8xf32>
    %cst_119 = arith.constant dense<0.000000e+00> : vector<8xf32>
    %446 = vector.multi_reduction <add>, %445, %cst_119 [0] : vector<4x8xf32> to vector<8xf32>
    %447 = vector.shape_cast %446 : vector<8xf32> to vector<1x8xf32>
    %448 = arith.addf %444, %447 : vector<1x8xf32>
    %cst_120 = arith.constant 5.000000e-01 : f32
    %449 = vector.broadcast %cst_120 : f32 to vector<1x8xf32>
    %450 = arith.mulf %449, %448 : vector<1x8xf32>
    %451 = vector.broadcast %450 : vector<1x8xf32> to vector<4x8xf32>
    %452 = arith.subf %451, %418 : vector<4x8xf32>
    %453 = arith.mulf %441, %452 : vector<4x8xf32>
    %454 = arith.addf %418, %453 : vector<4x8xf32>
    %c12_121 = arith.constant 12 : index
    %455 = memref.load %arg5[%c12_121] : memref<16xf32, #tpu.memory_space<smem>>
    %456 = arith.mulf %444, %447 : vector<1x8xf32>
    %457 = vector.broadcast %456 : vector<1x8xf32> to vector<8x8xf32>
    %458 = arith.subf %457, %425 : vector<8x8xf32>
    %459 = vector.broadcast %455 : f32 to vector<8x8xf32>
    %460 = arith.mulf %459, %458 : vector<8x8xf32>
    %461 = arith.addf %425, %460 : vector<8x8xf32>
    %462 = arith.subf %0, %461 : vector<8x8xf32>
    %463 = arith.mulf %1, %462 : vector<8x8xf32>
    %464 = arith.mulf %463, %462 : vector<8x8xf32>
    %cst_122 = arith.constant dense<0.000000e+00> : vector<8xf32>
    %465 = vector.multi_reduction <add>, %464, %cst_122 [1] : vector<8x8xf32> to vector<8xf32>
    %466 = vector.shape_cast %465 : vector<8xf32> to vector<8x1xf32>
    %cst_123 = arith.constant dense<0.000000e+00> : vector<1xf32>
    %467 = vector.multi_reduction <add>, %466, %cst_123 [0] : vector<8x1xf32> to vector<1xf32>
    %468 = vector.shape_cast %467 : vector<1xf32> to vector<1x1xf32>
    %c12_124 = arith.constant 12 : index
    %469 = memref.load %arg6[%c12_124] : memref<16xf32, #tpu.memory_space<smem>>
    %470 = vector.broadcast %469 : f32 to vector<1x1xf32>
    %471 = arith.mulf %470, %468 : vector<1x1xf32>
    %472 = arith.addf %436, %471 : vector<1x1xf32>
    %c13 = arith.constant 13 : index
    %c0_125 = arith.constant 0 : index
    %c0_126 = arith.constant 0 : index
    %473 = vector.load %arg0[%c13, %c0_125, %c0_126] : memref<16x12x8xf32, #tpu.memory_space<vmem>>, vector<1x12x8xf32>
    %474 = vector.shape_cast %473 : vector<1x12x8xf32> to vector<12x8xf32>
    %475 = vector.extract_strided_slice %474 {offsets = [0, 0], sizes = [4, 8], strides = [1, 1]} : vector<12x8xf32> to vector<4x8xf32>
    %476 = vector.extract_strided_slice %474 {offsets = [4, 0], sizes = [4, 8], strides = [1, 1]} : vector<12x8xf32> to vector<4x8xf32>
    %477 = vector.extract_strided_slice %474 {offsets = [8, 0], sizes = [4, 8], strides = [1, 1]} : vector<12x8xf32> to vector<4x8xf32>
    %478 = arith.mulf %475, %454 : vector<4x8xf32>
    %cst_127 = arith.constant dense<0.000000e+00> : vector<8xf32>
    %479 = vector.multi_reduction <add>, %478, %cst_127 [0] : vector<4x8xf32> to vector<8xf32>
    %480 = vector.shape_cast %479 : vector<8xf32> to vector<1x8xf32>
    %481 = arith.mulf %476, %454 : vector<4x8xf32>
    %cst_128 = arith.constant dense<0.000000e+00> : vector<8xf32>
    %482 = vector.multi_reduction <add>, %481, %cst_128 [0] : vector<4x8xf32> to vector<8xf32>
    %483 = vector.shape_cast %482 : vector<8xf32> to vector<1x8xf32>
    %484 = arith.addf %480, %483 : vector<1x8xf32>
    %cst_129 = arith.constant 5.000000e-01 : f32
    %485 = vector.broadcast %cst_129 : f32 to vector<1x8xf32>
    %486 = arith.mulf %485, %484 : vector<1x8xf32>
    %487 = vector.broadcast %486 : vector<1x8xf32> to vector<4x8xf32>
    %488 = arith.subf %487, %454 : vector<4x8xf32>
    %489 = arith.mulf %477, %488 : vector<4x8xf32>
    %490 = arith.addf %454, %489 : vector<4x8xf32>
    %c13_130 = arith.constant 13 : index
    %491 = memref.load %arg5[%c13_130] : memref<16xf32, #tpu.memory_space<smem>>
    %492 = arith.mulf %480, %483 : vector<1x8xf32>
    %493 = vector.broadcast %492 : vector<1x8xf32> to vector<8x8xf32>
    %494 = arith.subf %493, %461 : vector<8x8xf32>
    %495 = vector.broadcast %491 : f32 to vector<8x8xf32>
    %496 = arith.mulf %495, %494 : vector<8x8xf32>
    %497 = arith.addf %461, %496 : vector<8x8xf32>
    %498 = arith.subf %0, %497 : vector<8x8xf32>
    %499 = arith.mulf %1, %498 : vector<8x8xf32>
    %500 = arith.mulf %499, %498 : vector<8x8xf32>
    %cst_131 = arith.constant dense<0.000000e+00> : vector<8xf32>
    %501 = vector.multi_reduction <add>, %500, %cst_131 [1] : vector<8x8xf32> to vector<8xf32>
    %502 = vector.shape_cast %501 : vector<8xf32> to vector<8x1xf32>
    %cst_132 = arith.constant dense<0.000000e+00> : vector<1xf32>
    %503 = vector.multi_reduction <add>, %502, %cst_132 [0] : vector<8x1xf32> to vector<1xf32>
    %504 = vector.shape_cast %503 : vector<1xf32> to vector<1x1xf32>
    %c13_133 = arith.constant 13 : index
    %505 = memref.load %arg6[%c13_133] : memref<16xf32, #tpu.memory_space<smem>>
    %506 = vector.broadcast %505 : f32 to vector<1x1xf32>
    %507 = arith.mulf %506, %504 : vector<1x1xf32>
    %508 = arith.addf %472, %507 : vector<1x1xf32>
    %c14 = arith.constant 14 : index
    %c0_134 = arith.constant 0 : index
    %c0_135 = arith.constant 0 : index
    %509 = vector.load %arg0[%c14, %c0_134, %c0_135] : memref<16x12x8xf32, #tpu.memory_space<vmem>>, vector<1x12x8xf32>
    %510 = vector.shape_cast %509 : vector<1x12x8xf32> to vector<12x8xf32>
    %511 = vector.extract_strided_slice %510 {offsets = [0, 0], sizes = [4, 8], strides = [1, 1]} : vector<12x8xf32> to vector<4x8xf32>
    %512 = vector.extract_strided_slice %510 {offsets = [4, 0], sizes = [4, 8], strides = [1, 1]} : vector<12x8xf32> to vector<4x8xf32>
    %513 = vector.extract_strided_slice %510 {offsets = [8, 0], sizes = [4, 8], strides = [1, 1]} : vector<12x8xf32> to vector<4x8xf32>
    %514 = arith.mulf %511, %490 : vector<4x8xf32>
    %cst_136 = arith.constant dense<0.000000e+00> : vector<8xf32>
    %515 = vector.multi_reduction <add>, %514, %cst_136 [0] : vector<4x8xf32> to vector<8xf32>
    %516 = vector.shape_cast %515 : vector<8xf32> to vector<1x8xf32>
    %517 = arith.mulf %512, %490 : vector<4x8xf32>
    %cst_137 = arith.constant dense<0.000000e+00> : vector<8xf32>
    %518 = vector.multi_reduction <add>, %517, %cst_137 [0] : vector<4x8xf32> to vector<8xf32>
    %519 = vector.shape_cast %518 : vector<8xf32> to vector<1x8xf32>
    %520 = arith.addf %516, %519 : vector<1x8xf32>
    %cst_138 = arith.constant 5.000000e-01 : f32
    %521 = vector.broadcast %cst_138 : f32 to vector<1x8xf32>
    %522 = arith.mulf %521, %520 : vector<1x8xf32>
    %523 = vector.broadcast %522 : vector<1x8xf32> to vector<4x8xf32>
    %524 = arith.subf %523, %490 : vector<4x8xf32>
    %525 = arith.mulf %513, %524 : vector<4x8xf32>
    %526 = arith.addf %490, %525 : vector<4x8xf32>
    %c14_139 = arith.constant 14 : index
    %527 = memref.load %arg5[%c14_139] : memref<16xf32, #tpu.memory_space<smem>>
    %528 = arith.mulf %516, %519 : vector<1x8xf32>
    %529 = vector.broadcast %528 : vector<1x8xf32> to vector<8x8xf32>
    %530 = arith.subf %529, %497 : vector<8x8xf32>
    %531 = vector.broadcast %527 : f32 to vector<8x8xf32>
    %532 = arith.mulf %531, %530 : vector<8x8xf32>
    %533 = arith.addf %497, %532 : vector<8x8xf32>
    %534 = arith.subf %0, %533 : vector<8x8xf32>
    %535 = arith.mulf %1, %534 : vector<8x8xf32>
    %536 = arith.mulf %535, %534 : vector<8x8xf32>
    %cst_140 = arith.constant dense<0.000000e+00> : vector<8xf32>
    %537 = vector.multi_reduction <add>, %536, %cst_140 [1] : vector<8x8xf32> to vector<8xf32>
    %538 = vector.shape_cast %537 : vector<8xf32> to vector<8x1xf32>
    %cst_141 = arith.constant dense<0.000000e+00> : vector<1xf32>
    %539 = vector.multi_reduction <add>, %538, %cst_141 [0] : vector<8x1xf32> to vector<1xf32>
    %540 = vector.shape_cast %539 : vector<1xf32> to vector<1x1xf32>
    %c14_142 = arith.constant 14 : index
    %541 = memref.load %arg6[%c14_142] : memref<16xf32, #tpu.memory_space<smem>>
    %542 = vector.broadcast %541 : f32 to vector<1x1xf32>
    %543 = arith.mulf %542, %540 : vector<1x1xf32>
    %544 = arith.addf %508, %543 : vector<1x1xf32>
    %c15 = arith.constant 15 : index
    %c0_143 = arith.constant 0 : index
    %c0_144 = arith.constant 0 : index
    %545 = vector.load %arg0[%c15, %c0_143, %c0_144] : memref<16x12x8xf32, #tpu.memory_space<vmem>>, vector<1x12x8xf32>
    %546 = vector.shape_cast %545 : vector<1x12x8xf32> to vector<12x8xf32>
    %547 = vector.extract_strided_slice %546 {offsets = [0, 0], sizes = [4, 8], strides = [1, 1]} : vector<12x8xf32> to vector<4x8xf32>
    %548 = vector.extract_strided_slice %546 {offsets = [4, 0], sizes = [4, 8], strides = [1, 1]} : vector<12x8xf32> to vector<4x8xf32>
    %549 = arith.mulf %547, %526 : vector<4x8xf32>
    %cst_145 = arith.constant dense<0.000000e+00> : vector<8xf32>
    %550 = vector.multi_reduction <add>, %549, %cst_145 [0] : vector<4x8xf32> to vector<8xf32>
    %551 = vector.shape_cast %550 : vector<8xf32> to vector<1x8xf32>
    %552 = arith.mulf %548, %526 : vector<4x8xf32>
    %cst_146 = arith.constant dense<0.000000e+00> : vector<8xf32>
    %553 = vector.multi_reduction <add>, %552, %cst_146 [0] : vector<4x8xf32> to vector<8xf32>
    %554 = vector.shape_cast %553 : vector<8xf32> to vector<1x8xf32>
    %c15_147 = arith.constant 15 : index
    %555 = memref.load %arg5[%c15_147] : memref<16xf32, #tpu.memory_space<smem>>
    %556 = arith.mulf %551, %554 : vector<1x8xf32>
    %557 = vector.broadcast %556 : vector<1x8xf32> to vector<8x8xf32>
    %558 = arith.subf %557, %533 : vector<8x8xf32>
    %559 = vector.broadcast %555 : f32 to vector<8x8xf32>
    %560 = arith.mulf %559, %558 : vector<8x8xf32>
    %561 = arith.addf %533, %560 : vector<8x8xf32>
    %562 = arith.subf %0, %561 : vector<8x8xf32>
    %563 = arith.mulf %1, %562 : vector<8x8xf32>
    %564 = arith.mulf %563, %562 : vector<8x8xf32>
    %cst_148 = arith.constant dense<0.000000e+00> : vector<8xf32>
    %565 = vector.multi_reduction <add>, %564, %cst_148 [1] : vector<8x8xf32> to vector<8xf32>
    %566 = vector.shape_cast %565 : vector<8xf32> to vector<8x1xf32>
    %cst_149 = arith.constant dense<0.000000e+00> : vector<1xf32>
    %567 = vector.multi_reduction <add>, %566, %cst_149 [0] : vector<8x1xf32> to vector<1xf32>
    %568 = vector.shape_cast %567 : vector<1xf32> to vector<1x1xf32>
    %c15_150 = arith.constant 15 : index
    %569 = memref.load %arg6[%c15_150] : memref<16xf32, #tpu.memory_space<smem>>
    %570 = vector.broadcast %569 : f32 to vector<1x1xf32>
    %571 = arith.mulf %570, %568 : vector<1x1xf32>
    %572 = arith.addf %544, %571 : vector<1x1xf32>
    %573 = arith.subf %0, %561 : vector<8x8xf32>
    %574 = arith.mulf %1, %573 : vector<8x8xf32>
    %575 = arith.mulf %574, %573 : vector<8x8xf32>
    %cst_151 = arith.constant dense<0.000000e+00> : vector<8xf32>
    %576 = vector.multi_reduction <add>, %575, %cst_151 [1] : vector<8x8xf32> to vector<8xf32>
    %577 = vector.shape_cast %576 : vector<8xf32> to vector<8x1xf32>
    %cst_152 = arith.constant dense<0.000000e+00> : vector<1xf32>
    %578 = vector.multi_reduction <add>, %577, %cst_152 [0] : vector<8x1xf32> to vector<1xf32>
    %579 = vector.shape_cast %578 : vector<1xf32> to vector<1x1xf32>
    %cst_153 = arith.constant 2.000000e-01 : f32
    %580 = vector.broadcast %cst_153 : f32 to vector<1x1xf32>
    %581 = arith.mulf %580, %579 : vector<1x1xf32>
    %cst_154 = arith.constant 2.000000e-01 : f32
    %582 = vector.broadcast %cst_154 : f32 to vector<1x1xf32>
    %583 = arith.mulf %582, %572 : vector<1x1xf32>
    %584 = arith.addf %581, %583 : vector<1x1xf32>
    %cst_155 = arith.constant 4.06835938 : f32
    %585 = vector.broadcast %cst_155 : f32 to vector<1x1xf32>
    %586 = arith.addf %584, %585 : vector<1x1xf32>
    %c0_156 = arith.constant 0 : index
    %c0_157 = arith.constant 0 : index
    %587 = vector.load %arg7[%c0_156, %c0_157] : memref<1x1xf32, #tpu.memory_space<vmem>>, vector<1x1xf32>
    tpu.vector_store %arg7[%c0_156, %c0_157], %586 {strides = array<i32>} : memref<1x1xf32, #tpu.memory_space<vmem>>, vector<1x1xf32>,
    return
  }
}

</mosaic_0001>

<bundles_post_ra>
// kernel: tpu_custom_call.1
= control target key start
LH: loop header
LB: loop body
LE: loop exit
PB: predicated region body
PF: predicated region fallthrough
CT: control target
= control target key end

     0   :  { %12 = vsyncpa [#allocation4], 0  ;;  %s1287_s0 = inlined_call_operand.vmem [shape: f32[16,12,8], index: 0, kind: input, shape index: {}]   ;;  %s1288_s1 = inlined_call_operand.vmem [shape: f32[4,8], index: 1, kind: input, shape index: {}]   ;;  %s1289_s2 = inlined_call_operand.vmem [shape: f32[8,8], index: 2, kind: input, shape index: {}]   ;;  %s1290_s3 = inlined_call_operand.vmem [shape: f32[8,8], index: 3, kind: input, shape index: {}]   ;;  %s1291_s4 = inlined_call_operand.vmem [shape: f32[8,8], index: 4, kind: input, shape index: {}]   ;;  %s1292_s5 = inlined_call_operand.vmem [shape: f32[16], index: 5, kind: input, shape index: {}]   ;;  %s1293_s6 = inlined_call_operand.vmem [shape: f32[16], index: 6, kind: input, shape index: {}]   ;;  %s1294_s7 = inlined_call_operand.hbm [shape: f32[1,1], index: 7, kind: output, shape index: {}]  }
   0x1   :  { %13 = vsyncpa [#allocation6], 0 }
   0x2   :  { %14 = vsyncpa [#allocation3], 0  ;;  %s30_s26 = sshll.u32 %s1292_s5, 4  ;;  %s39_s29 = sshll.u32 %s1293_s6, 4  ;;  %s31_s26 = int_to_ptr.vmem [resolvable:$true] %s30_s26  ;;  %s40_s29 = int_to_ptr.vmem [resolvable:$true] %s39_s29 }
   0x3   :  { %s1025_s30 = smov [#allocation2]   ;;  %s1026_s8 = smov [#allocation5]  }
   0x4   :  { %33 = dma.vmem_to_smem %s31_s26, 16, %s1025_s30, [#allocation4]  }
   0x5   :  { %42 = dma.vmem_to_smem %s40_s29, 16, %s1026_s8, [#allocation6]  }
   0x6   :  { %1019 = dma.done.wait [#allocation4], 16  }
   0x7   :  { %1020 = vsyncadd [#allocation4], 4294967280 }
   0x8   :  { %1021 = dma.done.wait [#allocation6], 16  }
   0x9   :  { %1022 = vsyncadd [#allocation6], 4294967280 }
   0xa   :  { %51 = sfence }
   0xb   :  { %v55_v0 = vld [vmem:[%s1288_s1] sm:$0xf]  ;;  %vm59_vm0 = vcmask 60416   ;;  %s86_s1 = sld [smem:[#allocation2]]  ;;  %v57_v26 = vld [vmem:[%s1287_s0 + $0x8] sm:$0xf] }
   0xc   :  { %v56_v1 = vld [vmem:[%s1287_s0] sm:$0xff]  ;;  %v68_v3 = vrot.slane %v55_v0, 4  ;;  %v907_v35 = vld [vmem:[%s1287_s0 + $0x10] sm:$0xff]  ;;  %vm95_vm1 = vcmask 64512   ;;  %v908_v59 = vld [vmem:[%s1287_s0 + $0x18] sm:$0xf] }
   0xd   :  { %v58_v2 = vmul.f32 %v56_v1, %v55_v0  ;;  %v54_v20 = vld [vmem:[%s1289_s2] sm:$0xff]  ;;  %s909_s24 = sld [smem:[#allocation2 + $0x1]]  ;;  %s1027_s27 = smov [#allocation7]   ;;  %vm887_vm2 = vcmask 0  }
   0xe   :  { %v70_v5 = vmul.f32 %v68_v3, %v56_v1  ;;  %v1091_v29 = vld [vmem:[%s1290_s3] sm:$0xff]  ;;  %s913_s25 = sld [smem:[#allocation2 + $0x2]] }
   0xf   :  { %v60_v4 = vsel %vm59_vm0, %v58_v2, 0.0  ;;  %v1096_v32 = vld [vmem:[%s1291_s4] sm:$0xff]  ;;  %s917_s5 = sld [smem:[#allocation2 + $0x3]] }
  0x10   :  { %v61_v6 = vrot.slane %v60_v4, 4  ;;  %v72_v7 = vrot.slane %v70_v5, 4  ;;  %v911_v63 = vld [vmem:[%s1287_s0 + $0x20] sm:$0xff]  ;;  %s921_s11 = sld [smem:[#allocation2 + $0x4]] }
  0x11   :  { %v89_v23 = vstv %s86_s1  ;;  %s925_s14 = sld [smem:[#allocation2 + $0x5]] }
  0x12   :  { %v62_v8 = vadd.f32 %v61_v6, %v60_v4  ;;  %v74_v9 = vsel %vm59_vm0, %v72_v7, 0.0  ;;  %s929_s18 = sld [smem:[#allocation2 + $0x6]] }
  0x13   :  { %v75_v11 = vrot.slane %v74_v9, 4  ;;  %s933_s23 = sld [smem:[#allocation2 + $0x7]] }
  0x14   :  { %v63_v10 = vrot.slane %v62_v8, 2  ;;  %s937_s28 = sld [smem:[#allocation2 + $0x8]] }
  0x15   :  { %v76_v13 = vadd.f32 %v75_v11, %v74_v9  ;;  %s941_s10 = sld [smem:[#allocation2 + $0x9]] }
  0x16   :  { %v64_v12 = vadd.f32 %v63_v10, %v62_v8  ;;  %s945_s12 = sld [smem:[#allocation2 + $0xa]] }
  0x17   :  { %v77_v15 = vrot.slane %v76_v13, 2  ;;  %s949_s17 = sld [smem:[#allocation2 + $0xb]] }
  0x18   :  { %v65_v14 = vrot.slane %v64_v12, 1  ;;  %s953_s21 = sld [smem:[#allocation2 + $0xc]] }
  0x19   :  { %v78_v16 = vadd.f32 %v77_v15, %v76_v13  ;;  %s957_s26 = sld [smem:[#allocation2 + $0xd]] }
  0x1a   :  { %v66_v17 = vadd.f32 %v65_v14, %v64_v12  ;;  %v142_v14 = vstv %s909_s24  ;;  %s961_s8 = sld [smem:[#allocation2 + $0xe]] }
  0x1b   :  { %v79_v18 = vrot.slane %v78_v16, 1  ;;  %s1272_s15 = sld [smem:[#allocation5 + $0x3]] }
  0x1c   :  { %s922_s16 = sld [smem:[#allocation5 + $0x4]] }
  0x1d   :  { %v80_v19 = vadd.f32 %v79_v18, %v78_v16  ;;  %s1277_s2 = sld [smem:[#allocation5 + $0x6]] }
  0x1e   :  { %s938_s19 = sld [smem:[#allocation5 + $0x8]] }
  0x1f   :  { %v81_v21 = vadd.f32 %v80_v19, %v66_v17  ;;  %v87_v22 = vmul.f32 %v80_v19, %v66_v17  ;;  %s942_s20 = sld [smem:[#allocation5 + $0x9]] }
  0x20   :  { %s950_s22 = sld [smem:[#allocation5 + $0xb]] }
  0x21   :  { %v82_v24 = vmul.f32 0.5, %v81_v21  ;;  %v88_v25 = vsub.f32 %v87_v22, %v54_v20  ;;  %s958_s24 = sld [smem:[#allocation5 + $0xd]] }
  0x23   :  { %v83_v27 = vsub.f32 %v82_v24, %v55_v0  ;;  %v90_v28 = vmul.f32 %v89_v23, %v88_v25  ;;  %v194_v25 = vstv %s913_s25  ;;  %s962_s25 = sld [smem:[#allocation5 + $0xe]] }
  0x25   :  { %v84_v30 = vmul.f32 %v83_v27, %v57_v26  ;;  %v91_v31 = vadd.f32 %v90_v28, %v54_v20  ;;  %v912_v28 = vld [vmem:[%s1287_s0 + $0x28] sm:$0xf] }
  0x27   :  { %v85_v33 = vadd.f32 %v84_v30, %v55_v0  ;;  %v92_v34 = vsub.f32 %v1091_v29, %v91_v31 }
  0x29   :  { %v93_v36 = vmul.f32 %v92_v34, %v1096_v32  ;;  %v112_v37 = vmul.f32 %v907_v35, %v85_v33  ;;  %v121_v38 = vrot.slane %v85_v33, 4 }
  0x2b   :  { %v94_v39 = vmul.f32 %v93_v36, %v92_v34  ;;  %v113_v40 = vsel %vm59_vm0, %v112_v37, 0.0  ;;  %v123_v41 = vmul.f32 %v907_v35, %v121_v38  ;;  %v915_v37 = vld [vmem:[%s1287_s0 + $0x30] sm:$0xff] }
  0x2c   :  { %v114_v42 = vrot.slane %v113_v40, 4 }
  0x2d   :  { %v96_v43 = vsel %vm95_vm1, %v94_v39, 0.0  ;;  %v125_v44 = vrot.slane %v123_v41, 4 }
  0x2e   :  { %v115_v45 = vadd.f32 %v114_v42, %v113_v40  ;;  %97 = vadd.xlane.f32.xlu0 %v96_v43 }
  0x2f   :  { %v127_v46 = vsel %vm59_vm0, %v125_v44, 0.0 }
  0x30   :  { %v116_v47 = vrot.slane %v115_v45, 2  ;;  %v128_v48 = vrot.slane %v127_v46, 4 }
  0x32   :  { %v117_v49 = vadd.f32 %v116_v47, %v115_v45  ;;  %v129_v50 = vadd.f32 %v128_v48, %v127_v46 }
  0x34   :  { %v118_v51 = vrot.slane %v117_v49, 1  ;;  %v130_v52 = vrot.slane %v129_v50, 2 }
  0x36   :  { %v131_v53 = vadd.f32 %v130_v52, %v129_v50  ;;  %v119_v54 = vadd.f32 %v118_v51, %v117_v49 }
  0x38   :  { %v132_v55 = vrot.slane %v131_v53, 1 }
  0x3a   :  { %v133_v56 = vadd.f32 %v132_v55, %v131_v53 }
  0x3c   :  { %v134_v57 = vadd.f32 %v133_v56, %v119_v54  ;;  %v140_v6 = vmul.f32 %v133_v56, %v119_v54 }
  0x3e   :  { %v135_v58 = vmul.f32 0.5, %v134_v57  ;;  %v141_v11 = vsub.f32 %v140_v6, %v91_v31 }
  0x40   :  { %v136_v60 = vsub.f32 %v135_v58, %v85_v33  ;;  %v143_v17 = vmul.f32 %v142_v14, %v141_v11 }
  0x42   :  { %v137_v61 = vmul.f32 %v908_v59, %v136_v60  ;;  %v1114_v21 = vadd.f32 %v143_v17, %v91_v31 }
  0x44   :  { %v138_v62 = vadd.f32 %v137_v61, %v85_v33  ;;  %v916_v61 = vld [vmem:[%s1287_s0 + $0x38] sm:$0xf] }
  0x46   :  { %v164_v0 = vmul.f32 %v911_v63, %v138_v62  ;;  %v173_v1 = vrot.slane %v138_v62, 4 }
  0x48   :  { %v165_v2 = vsel %vm59_vm0, %v164_v0, 0.0  ;;  %v175_v3 = vmul.f32 %v911_v63, %v173_v1  ;;  %v919_v1 = vld [vmem:[%s1287_s0 + $0x40] sm:$0xff] }
  0x49   :  { %v166_v4 = vrot.slane %v165_v2, 4 }
  0x4a   :  { %v177_v5 = vrot.slane %v175_v3, 4 }
  0x4b   :  { %v167_v7 = vadd.f32 %v166_v4, %v165_v2 }
  0x4c   :  { %v179_v8 = vsel %vm59_vm0, %v177_v5, 0.0 }
  0x4d   :  { %v168_v9 = vrot.slane %v167_v7, 2  ;;  %v180_v10 = vrot.slane %v179_v8, 4 }
  0x4f   :  { %v169_v12 = vadd.f32 %v168_v9, %v167_v7  ;;  %v181_v13 = vadd.f32 %v180_v10, %v179_v8 }
  0x51   :  { %v170_v15 = vrot.slane %v169_v12, 1  ;;  %v182_v16 = vrot.slane %v181_v13, 2 }
  0x53   :  { %v183_v18 = vadd.f32 %v182_v16, %v181_v13  ;;  %v171_v19 = vadd.f32 %v170_v15, %v169_v12  ;;  %v246_v16 = vstv %s917_s5 }
  0x55   :  { %v184_v20 = vrot.slane %v183_v18, 1 }
  0x57   :  { %v185_v22 = vadd.f32 %v184_v20, %v183_v18 }
  0x59   :  { %v186_v23 = vadd.f32 %v185_v22, %v171_v19  ;;  %v192_v24 = vmul.f32 %v185_v22, %v171_v19 }
  0x5b   :  { %v187_v26 = vmul.f32 0.5, %v186_v23  ;;  %v193_v27 = vsub.f32 %v192_v24, %v1114_v21 }
  0x5d   :  { %v188_v30 = vsub.f32 %v187_v26, %v138_v62  ;;  %v195_v33 = vmul.f32 %v194_v25, %v193_v27 }
  0x5f   :  { %v189_v34 = vmul.f32 %v912_v28, %v188_v30  ;;  %v196_v35 = vadd.f32 %v195_v33, %v1114_v21  ;;  %v298_v28 = vstv %s921_s11 }
  0x61   :  { %v190_v36 = vadd.f32 %v189_v34, %v138_v62  ;;  %v197_v31 = vsub.f32 %v1091_v29, %v196_v35  ;;  %v920_v34 = vld [vmem:[%s1287_s0 + $0x48] sm:$0xf] }
  0x63   :  { %v198_v38 = vmul.f32 %v197_v31, %v1096_v32  ;;  %v216_v39 = vmul.f32 %v915_v37, %v190_v36  ;;  %v225_v40 = vrot.slane %v190_v36, 4 }
  0x65   :  { %v199_v41 = vmul.f32 %v198_v38, %v197_v31  ;;  %v217_v42 = vsel %vm59_vm0, %v216_v39, 0.0  ;;  %v227_v43 = vmul.f32 %v915_v37, %v225_v40  ;;  %v145_v37 = vsub.f32 %v1091_v29, %v1114_v21 }
  0x66   :  { %v218_v44 = vrot.slane %v217_v42, 4 }
  0x67   :  { %v200_v45 = vsel %vm95_vm1, %v199_v41, 0.0  ;;  %v229_v46 = vrot.slane %v227_v43, 4 }
  0x68   :  { %v219_v47 = vadd.f32 %v218_v44, %v217_v42  ;;  %201 = vadd.xlane.f32.xlu1 %v200_v45  ;;  %v923_v44 = vld [vmem:[%s1287_s0 + $0x50] sm:$0xff] }
  0x69   :  { %v231_v48 = vsel %vm59_vm0, %v229_v46, 0.0 }
  0x6a   :  { %v220_v49 = vrot.slane %v219_v47, 2  ;;  %v232_v50 = vrot.slane %v231_v48, 4 }
  0x6c   :  { %v221_v51 = vadd.f32 %v220_v49, %v219_v47  ;;  %v233_v52 = vadd.f32 %v232_v50, %v231_v48 }
  0x6e   :  { %v222_v53 = vrot.slane %v221_v51, 1  ;;  %v234_v54 = vrot.slane %v233_v52, 2 }
  0x70   :  { %v235_v55 = vadd.f32 %v234_v54, %v233_v52  ;;  %v223_v56 = vadd.f32 %v222_v53, %v221_v51 }
  0x72   :  { %v236_v57 = vrot.slane %v235_v55, 1 }
  0x74   :  { %v237_v58 = vadd.f32 %v236_v57, %v235_v55 }
  0x76   :  { %v238_v59 = vadd.f32 %v237_v58, %v223_v56  ;;  %v244_v8 = vmul.f32 %v237_v58, %v223_v56 }
  0x78   :  { %v239_v60 = vmul.f32 0.5, %v238_v59  ;;  %v245_v13 = vsub.f32 %v244_v8, %v196_v35 }
  0x7a   :  { %v240_v62 = vsub.f32 %v239_v60, %v190_v36  ;;  %v247_v19 = vmul.f32 %v246_v16, %v245_v13 }
  0x7c   :  { %v241_v63 = vmul.f32 %v916_v61, %v240_v62  ;;  %v248_v24 = vadd.f32 %v247_v19, %v196_v35  ;;  %v146_v35 = vmul.f32 %v145_v37, %v1096_v32 }
  0x7e   :  { %v242_v0 = vadd.f32 %v241_v63, %v190_v36  ;;  %v249_v38 = vsub.f32 %v1091_v29, %v248_v24  ;;  %v147_v45 = vmul.f32 %v146_v35, %v145_v37 }
  0x80   :  { %v268_v2 = vmul.f32 %v919_v1, %v242_v0  ;;  %v277_v3 = vrot.slane %v242_v0, 4  ;;  %v250_v41 = vmul.f32 %v249_v38, %v1096_v32  ;;  %v148_v49 = vsel %vm95_vm1, %v147_v45, 0.0 }
  0x81   :  { %149 = vadd.xlane.f32.xlu0 %v148_v49 }
  0x82   :  { %v269_v4 = vsel %vm59_vm0, %v268_v2, 0.0  ;;  %v279_v5 = vmul.f32 %v919_v1, %v277_v3  ;;  %v251_v46 = vmul.f32 %v250_v41, %v249_v38 }
  0x83   :  { %v270_v6 = vrot.slane %v269_v4, 4 }
  0x84   :  { %v281_v7 = vrot.slane %v279_v5, 4  ;;  %v252_v50 = vsel %vm95_vm1, %v251_v46, 0.0 }
  0x85   :  { %v271_v9 = vadd.f32 %v270_v6, %v269_v4  ;;  %253 = vadd.xlane.f32.xlu1 %v252_v50 }
  0x86   :  { %v283_v10 = vsel %vm59_vm0, %v281_v7, 0.0  ;;  %v350_v7 = vstv %s925_s14  ;;  %s914_s14 = sld [smem:[#allocation5 + $0x2]] }
  0x87   :  { %v272_v11 = vrot.slane %v271_v9, 2  ;;  %v284_v12 = vrot.slane %v283_v10, 4 }
  0x89   :  { %v273_v14 = vadd.f32 %v272_v11, %v271_v9  ;;  %v285_v15 = vadd.f32 %v284_v12, %v283_v10  ;;  %v924_v10 = vld [vmem:[%s1287_s0 + $0x58] sm:$0xf] }
  0x8b   :  { %v274_v17 = vrot.slane %v273_v14, 1  ;;  %v286_v18 = vrot.slane %v285_v15, 2 }
  0x8d   :  { %v287_v20 = vadd.f32 %v286_v18, %v285_v15  ;;  %v275_v22 = vadd.f32 %v274_v17, %v273_v14  ;;  %v927_v17 = vld [vmem:[%s1287_s0 + $0x60] sm:$0xff] }
  0x8f   :  { %v288_v23 = vrot.slane %v287_v20, 1 }
  0x91   :  { %v289_v25 = vadd.f32 %v288_v23, %v287_v20 }
  0x93   :  { %v290_v26 = vadd.f32 %v289_v25, %v275_v22  ;;  %v296_v27 = vmul.f32 %v289_v25, %v275_v22 }
  0x95   :  { %v291_v30 = vmul.f32 0.5, %v290_v26  ;;  %v297_v33 = vsub.f32 %v296_v27, %v248_v24 }
  0x97   :  { %v292_v36 = vsub.f32 %v291_v30, %v242_v0  ;;  %v299_v31 = vmul.f32 %v298_v28, %v297_v33 }
  0x99   :  { %v293_v39 = vmul.f32 %v920_v34, %v292_v36  ;;  %v300_v40 = vadd.f32 %v299_v31, %v248_v24 }
  0x9b   :  { %v294_v42 = vadd.f32 %v293_v39, %v242_v0  ;;  %v301_v43 = vsub.f32 %v1091_v29, %v300_v40 }
  0x9d   :  { %v302_v47 = vmul.f32 %v301_v43, %v1096_v32  ;;  %v320_v21 = vmul.f32 %v923_v44, %v294_v42  ;;  %v329_v48 = vrot.slane %v294_v42, 4 }
  0x9f   :  { %v303_v51 = vmul.f32 %v302_v47, %v301_v43  ;;  %v321_v52 = vsel %vm59_vm0, %v320_v21, 0.0  ;;  %v331_v53 = vmul.f32 %v923_v44, %v329_v48  ;;  %v402_v44 = vstv %s929_s18  ;;  %v928_v47 = vld [vmem:[%s1287_s0 + $0x68] sm:$0xf]  ;;  %s1280_s18 = sld [smem:[#allocation5 + $0x7]] }
  0xa0   :  { %v322_v54 = vrot.slane %v321_v52, 4 }
  0xa1   :  { %v304_v55 = vsel %vm95_vm1, %v303_v51, 0.0  ;;  %v333_v56 = vrot.slane %v331_v53, 4  ;;  %v931_v53 = vld [vmem:[%s1287_s0 + $0x70] sm:$0xff] }
  0xa2   :  { %v323_v57 = vadd.f32 %v322_v54, %v321_v52  ;;  %305 = vadd.xlane.f32.xlu2 %v304_v55 }
  0xa3   :  { %v335_v58 = vsel %vm59_vm0, %v333_v56, 0.0 }
  0xa4   :  { %v324_v59 = vrot.slane %v323_v57, 2  ;;  %v336_v60 = vrot.slane %v335_v58, 4 }
  0xa6   :  { %v325_v61 = vadd.f32 %v324_v59, %v323_v57  ;;  %v337_v62 = vadd.f32 %v336_v60, %v335_v58 }
  0xa8   :  { %v326_v63 = vrot.slane %v325_v61, 1  ;;  %v338_v0 = vrot.slane %v337_v62, 2 }
  0xaa   :  { %v339_v1 = vadd.f32 %v338_v0, %v337_v62  ;;  %v327_v2 = vadd.f32 %v326_v63, %v325_v61 }
  0xac   :  { %v340_v3 = vrot.slane %v339_v1, 1 }
  0xae   :  { %v341_v4 = vadd.f32 %v340_v3, %v339_v1 }
  0xb0   :  { %v342_v5 = vadd.f32 %v341_v4, %v327_v2  ;;  %v348_v6 = vmul.f32 %v341_v4, %v327_v2 }
  0xb2   :  { %v343_v8 = vmul.f32 0.5, %v342_v5  ;;  %v349_v9 = vsub.f32 %v348_v6, %v300_v40 }
  0xb4   :  { %v344_v11 = vsub.f32 %v343_v8, %v294_v42  ;;  %v351_v12 = vmul.f32 %v350_v7, %v349_v9 }
  0xb6   :  { %v345_v13 = vmul.f32 %v924_v10, %v344_v11  ;;  %v352_v14 = vadd.f32 %v351_v12, %v300_v40 }
  0xb8   :  { %v346_v15 = vadd.f32 %v345_v13, %v294_v42  ;;  %v353_v16 = vsub.f32 %v1091_v29, %v352_v14  ;;  %v454_v13 = vstv %s933_s23  ;;  %s954_s23 = sld [smem:[#allocation5 + $0xc]] }
  0xba   :  { %v354_v18 = vmul.f32 %v353_v16, %v1096_v32  ;;  %v372_v19 = vmul.f32 %v927_v17, %v346_v15  ;;  %v381_v20 = vrot.slane %v346_v15, 4 }
  0xbc   :  { %v355_v22 = vmul.f32 %v354_v18, %v353_v16  ;;  %v373_v23 = vsel %vm59_vm0, %v372_v19, 0.0  ;;  %v383_v24 = vmul.f32 %v927_v17, %v381_v20  ;;  %v932_v16 = vld [vmem:[%s1287_s0 + $0x78] sm:$0xf] }
  0xbd   :  { %v374_v25 = vrot.slane %v373_v23, 4 }
  0xbe   :  { %v356_v26 = vsel %vm95_vm1, %v355_v22, 0.0  ;;  %v385_v27 = vrot.slane %v383_v24, 4  ;;  %v935_v24 = vld [vmem:[%s1287_s0 + $0x80] sm:$0xff] }
  0xbf   :  { %357 = vadd.xlane.f32.xlu2 %v356_v26  ;;  %v375_v28 = vadd.f32 %v374_v25, %v373_v23 }
  0xc0   :  { %v387_v30 = vsel %vm59_vm0, %v385_v27, 0.0 }
  0xc1   :  { %v376_v33 = vrot.slane %v375_v28, 2  ;;  %v388_v34 = vrot.slane %v387_v30, 4 }
  0xc3   :  { %v377_v36 = vadd.f32 %v376_v33, %v375_v28  ;;  %v389_v31 = vadd.f32 %v388_v34, %v387_v30 }
  0xc5   :  { %v378_v37 = vrot.slane %v377_v36, 1  ;;  %v390_v38 = vrot.slane %v389_v31, 2 }
  0xc7   :  { %v391_v39 = vadd.f32 %v390_v38, %v389_v31  ;;  %v379_v40 = vadd.f32 %v378_v37, %v377_v36 }
  0xc9   :  { %v392_v35 = vrot.slane %v391_v39, 1 }
  0xcb   :  { %v393_v41 = vadd.f32 %v392_v35, %v391_v39 }
  0xcd   :  { %v394_v42 = vadd.f32 %v393_v41, %v379_v40  ;;  %v400_v43 = vmul.f32 %v393_v41, %v379_v40 }
  0xcf   :  { %v395_v45 = vmul.f32 0.5, %v394_v42  ;;  %v401_v46 = vsub.f32 %v400_v43, %v352_v14 }
  0xd1   :  { %v396_v21 = vsub.f32 %v395_v45, %v346_v15  ;;  %v403_v48 = vmul.f32 %v402_v44, %v401_v46 }
  0xd3   :  { %v397_v49 = vmul.f32 %v928_v47, %v396_v21  ;;  %v404_v50 = vadd.f32 %v403_v48, %v352_v14 }
  0xd5   :  { %v398_v51 = vadd.f32 %v397_v49, %v346_v15  ;;  %v405_v52 = vsub.f32 %v1091_v29, %v404_v50  ;;  %v506_v49 = vstv %s937_s28  ;;  %s894_s28 = sshll.u32 %s1027_s27, 4  ;;  %s895_s28 = int_to_ptr.vmem [resolvable:$true] %s894_s28 }
  0xd7   :  { %v406_v54 = vmul.f32 %v405_v52, %v1096_v32  ;;  %v424_v55 = vmul.f32 %v931_v53, %v398_v51  ;;  %v433_v56 = vrot.slane %v398_v51, 4 }
  0xd9   :  { %v407_v57 = vmul.f32 %v406_v54, %v405_v52  ;;  %v425_v58 = vsel %vm59_vm0, %v424_v55, 0.0  ;;  %v435_v59 = vmul.f32 %v931_v53, %v433_v56  ;;  %v936_v52 = vld [vmem:[%s1287_s0 + $0x88] sm:$0xf] }
  0xda   :  { %v426_v60 = vrot.slane %v425_v58, 4 }
  0xdb   :  { %v408_v61 = vsel %vm95_vm1, %v407_v57, 0.0  ;;  %v437_v62 = vrot.slane %v435_v59, 4  ;;  %v939_v59 = vld [vmem:[%s1287_s0 + $0x90] sm:$0xff] }
  0xdc   :  { %409 = vadd.xlane.f32.xlu0 %v408_v61  ;;  %v427_v63 = vadd.f32 %v426_v60, %v425_v58 }
  0xdd   :  { %v439_v0 = vsel %vm59_vm0, %v437_v62, 0.0 }
  0xde   :  { %v428_v1 = vrot.slane %v427_v63, 2  ;;  %v440_v2 = vrot.slane %v439_v0, 4 }
  0xe0   :  { %v429_v3 = vadd.f32 %v428_v1, %v427_v63  ;;  %v441_v4 = vadd.f32 %v440_v2, %v439_v0 }
  0xe2   :  { %v430_v5 = vrot.slane %v429_v3, 1  ;;  %v442_v6 = vrot.slane %v441_v4, 2 }
  0xe4   :  { %v443_v7 = vadd.f32 %v442_v6, %v441_v4  ;;  %v431_v8 = vadd.f32 %v430_v5, %v429_v3 }
  0xe6   :  { %v444_v9 = vrot.slane %v443_v7, 1 }
  0xe8   :  { %v445_v10 = vadd.f32 %v444_v9, %v443_v7 }
  0xea   :  { %v446_v11 = vadd.f32 %v445_v10, %v431_v8  ;;  %v452_v12 = vmul.f32 %v445_v10, %v431_v8 }
  0xec   :  { %v447_v14 = vmul.f32 0.5, %v446_v11  ;;  %v453_v15 = vsub.f32 %v452_v12, %v404_v50 }
  0xee   :  { %v448_v17 = vsub.f32 %v447_v14, %v398_v51  ;;  %v455_v18 = vmul.f32 %v454_v13, %v453_v15 }
  0xf0   :  { %v449_v19 = vmul.f32 %v932_v16, %v448_v17  ;;  %v456_v20 = vadd.f32 %v455_v18, %v404_v50 }
  0xf2   :  { %v450_v22 = vadd.f32 %v449_v19, %v398_v51  ;;  %v457_v23 = vsub.f32 %v1091_v29, %v456_v20  ;;  %v558_v19 = vstv %s941_s10 }
  0xf4   :  { %v458_v25 = vmul.f32 %v457_v23, %v1096_v32  ;;  %v476_v26 = vmul.f32 %v935_v24, %v450_v22  ;;  %v485_v27 = vrot.slane %v450_v22, 4 }
  0xf6   :  { %v459_v28 = vmul.f32 %v458_v25, %v457_v23  ;;  %v477_v30 = vsel %vm59_vm0, %v476_v26, 0.0  ;;  %v487_v33 = vmul.f32 %v935_v24, %v485_v27  ;;  %v940_v23 = vld [vmem:[%s1287_s0 + $0x98] sm:$0xf] }
  0xf7   :  { %v478_v34 = vrot.slane %v477_v30, 4 }
  0xf8   :  { %v460_v36 = vsel %vm95_vm1, %v459_v28, 0.0  ;;  %v489_v31 = vrot.slane %v487_v33, 4  ;;  %v943_v33 = vld [vmem:[%s1287_s0 + $0xa0] sm:$0xff] }
  0xf9   :  { %461 = vadd.xlane.f32.xlu1 %v460_v36  ;;  %v479_v37 = vadd.f32 %v478_v34, %v477_v30 }
  0xfa   :  { %v491_v38 = vsel %vm59_vm0, %v489_v31, 0.0 }
  0xfb   :  { %v480_v39 = vrot.slane %v479_v37, 2  ;;  %v492_v40 = vrot.slane %v491_v38, 4 }
  0xfd   :  { %v481_v35 = vadd.f32 %v480_v39, %v479_v37  ;;  %v493_v41 = vadd.f32 %v492_v40, %v491_v38 }
  0xff   :  { %v482_v42 = vrot.slane %v481_v35, 1  ;;  %v494_v43 = vrot.slane %v493_v41, 2 }
 0x101   :  { %v495_v44 = vadd.f32 %v494_v43, %v493_v41  ;;  %v483_v45 = vadd.f32 %v482_v42, %v481_v35 }
 0x103   :  { %v496_v46 = vrot.slane %v495_v44, 1 }
 0x105   :  { %v497_v47 = vadd.f32 %v496_v46, %v495_v44 }
 0x107   :  { %v498_v21 = vadd.f32 %v497_v47, %v483_v45  ;;  %v504_v48 = vmul.f32 %v497_v47, %v483_v45 }
 0x109   :  { %v499_v50 = vmul.f32 0.5, %v498_v21  ;;  %v505_v51 = vsub.f32 %v504_v48, %v456_v20 }
 0x10b   :  { %v500_v53 = vsub.f32 %v499_v50, %v450_v22  ;;  %v507_v54 = vmul.f32 %v506_v49, %v505_v51 }
 0x10d   :  { %v501_v55 = vmul.f32 %v936_v52, %v500_v53  ;;  %v508_v56 = vadd.f32 %v507_v54, %v456_v20 }
 0x10f   :  { %v502_v57 = vadd.f32 %v501_v55, %v450_v22  ;;  %v509_v58 = vsub.f32 %v1091_v29, %v508_v56  ;;  %v610_v55 = vstv %s945_s12 }
 0x111   :  { %v510_v60 = vmul.f32 %v509_v58, %v1096_v32  ;;  %v528_v61 = vmul.f32 %v939_v59, %v502_v57  ;;  %v537_v62 = vrot.slane %v502_v57, 4 }
 0x113   :  { %v511_v63 = vmul.f32 %v510_v60, %v509_v58  ;;  %v529_v0 = vsel %vm59_vm0, %v528_v61, 0.0  ;;  %v539_v1 = vmul.f32 %v939_v59, %v537_v62  ;;  %v944_v58 = vld [vmem:[%s1287_s0 + $0xa8] sm:$0xf] }
 0x114   :  { %v530_v2 = vrot.slane %v529_v0, 4 }
 0x115   :  { %v512_v3 = vsel %vm95_vm1, %v511_v63, 0.0  ;;  %v541_v4 = vrot.slane %v539_v1, 4  ;;  %v947_v1 = vld [vmem:[%s1287_s0 + $0xb0] sm:$0xff] }
 0x116   :  { %513 = vadd.xlane.f32.xlu2 %v512_v3  ;;  %v531_v5 = vadd.f32 %v530_v2, %v529_v0 }
 0x117   :  { %v543_v6 = vsel %vm59_vm0, %v541_v4, 0.0 }
 0x118   :  { %v532_v7 = vrot.slane %v531_v5, 2  ;;  %v544_v8 = vrot.slane %v543_v6, 4 }
 0x11a   :  { %v533_v9 = vadd.f32 %v532_v7, %v531_v5  ;;  %v545_v10 = vadd.f32 %v544_v8, %v543_v6 }
 0x11c   :  { %v534_v11 = vrot.slane %v533_v9, 1  ;;  %v546_v12 = vrot.slane %v545_v10, 2 }
 0x11e   :  { %v547_v13 = vadd.f32 %v546_v12, %v545_v10  ;;  %v535_v14 = vadd.f32 %v534_v11, %v533_v9 }
 0x120   :  { %v548_v15 = vrot.slane %v547_v13, 1 }
 0x122   :  { %v549_v16 = vadd.f32 %v548_v15, %v547_v13 }
 0x124   :  { %v550_v17 = vadd.f32 %v549_v16, %v535_v14  ;;  %v556_v18 = vmul.f32 %v549_v16, %v535_v14 }
 0x126   :  { %v551_v20 = vmul.f32 0.5, %v550_v17  ;;  %v557_v22 = vsub.f32 %v556_v18, %v508_v56 }
 0x128   :  { %v552_v24 = vsub.f32 %v551_v20, %v502_v57  ;;  %v559_v25 = vmul.f32 %v558_v19, %v557_v22 }
 0x12a   :  { %v553_v26 = vmul.f32 %v940_v23, %v552_v24  ;;  %v560_v27 = vadd.f32 %v559_v25, %v508_v56 }
 0x12c   :  { %v554_v28 = vadd.f32 %v553_v26, %v502_v57  ;;  %v561_v30 = vsub.f32 %v1091_v29, %v560_v27  ;;  %v662_v26 = vstv %s949_s17  ;;  %s1274_s17 = sld [smem:[#allocation5 + $0x5]] }
 0x12e   :  { %v562_v34 = vmul.f32 %v561_v30, %v1096_v32  ;;  %v580_v36 = vmul.f32 %v943_v33, %v554_v28  ;;  %v589_v31 = vrot.slane %v554_v28, 4 }
 0x130   :  { %v563_v37 = vmul.f32 %v562_v34, %v561_v30  ;;  %v581_v38 = vsel %vm59_vm0, %v580_v36, 0.0  ;;  %v591_v39 = vmul.f32 %v943_v33, %v589_v31  ;;  %v948_v30 = vld [vmem:[%s1287_s0 + $0xb8] sm:$0xf] }
 0x131   :  { %v582_v40 = vrot.slane %v581_v38, 4 }
 0x132   :  { %v564_v35 = vsel %vm95_vm1, %v563_v37, 0.0  ;;  %v593_v41 = vrot.slane %v591_v39, 4  ;;  %v951_v39 = vld [vmem:[%s1287_s0 + $0xc0] sm:$0xff] }
 0x133   :  { %565 = vadd.xlane.f32.xlu0 %v564_v35  ;;  %v583_v42 = vadd.f32 %v582_v40, %v581_v38 }
 0x134   :  { %v595_v43 = vsel %vm59_vm0, %v593_v41, 0.0 }
 0x135   :  { %v584_v44 = vrot.slane %v583_v42, 2  ;;  %v596_v45 = vrot.slane %v595_v43, 4 }
 0x137   :  { %v585_v46 = vadd.f32 %v584_v44, %v583_v42  ;;  %v597_v47 = vadd.f32 %v596_v45, %v595_v43 }
 0x139   :  { %v586_v21 = vrot.slane %v585_v46, 1  ;;  %v598_v48 = vrot.slane %v597_v47, 2 }
 0x13b   :  { %v599_v49 = vadd.f32 %v598_v48, %v597_v47  ;;  %v587_v50 = vadd.f32 %v586_v21, %v585_v46 }
 0x13d   :  { %v600_v51 = vrot.slane %v599_v49, 1 }
 0x13f   :  { %v601_v52 = vadd.f32 %v600_v51, %v599_v49 }
 0x141   :  { %v602_v53 = vadd.f32 %v601_v52, %v587_v50  ;;  %v608_v54 = vmul.f32 %v601_v52, %v587_v50 }
 0x143   :  { %v603_v56 = vmul.f32 0.5, %v602_v53  ;;  %v609_v57 = vsub.f32 %v608_v54, %v560_v27 }
 0x145   :  { %v604_v59 = vsub.f32 %v603_v56, %v554_v28  ;;  %v611_v60 = vmul.f32 %v610_v55, %v609_v57 }
 0x147   :  { %v605_v61 = vmul.f32 %v944_v58, %v604_v59  ;;  %v612_v62 = vadd.f32 %v611_v60, %v560_v27 }
 0x149   :  { %v606_v63 = vadd.f32 %v605_v61, %v554_v28  ;;  %v613_v0 = vsub.f32 %v1091_v29, %v612_v62  ;;  %v714_v61 = vstv %s953_s21  ;;  %s946_s21 = sld [smem:[#allocation5 + $0xa]] }
 0x14b   :  { %v614_v2 = vmul.f32 %v613_v0, %v1096_v32  ;;  %v632_v3 = vmul.f32 %v947_v1, %v606_v63  ;;  %v641_v4 = vrot.slane %v606_v63, 4 }
 0x14d   :  { %v615_v5 = vmul.f32 %v614_v2, %v613_v0  ;;  %v633_v6 = vsel %vm59_vm0, %v632_v3, 0.0  ;;  %v643_v7 = vmul.f32 %v947_v1, %v641_v4  ;;  %v952_v0 = vld [vmem:[%s1287_s0 + $0xc8] sm:$0xf] }
 0x14e   :  { %v634_v8 = vrot.slane %v633_v6, 4 }
 0x14f   :  { %v616_v9 = vsel %vm95_vm1, %v615_v5, 0.0  ;;  %v645_v10 = vrot.slane %v643_v7, 4  ;;  %v955_v7 = vld [vmem:[%s1287_s0 + $0xd0] sm:$0xff] }
 0x150   :  { %617 = vadd.xlane.f32.xlu1 %v616_v9  ;;  %v635_v11 = vadd.f32 %v634_v8, %v633_v6 }
 0x151   :  { %v647_v12 = vsel %vm59_vm0, %v645_v10, 0.0 }
 0x152   :  { %v636_v13 = vrot.slane %v635_v11, 2  ;;  %v648_v14 = vrot.slane %v647_v12, 4 }
 0x154   :  { %v637_v15 = vadd.f32 %v636_v13, %v635_v11  ;;  %v649_v16 = vadd.f32 %v648_v14, %v647_v12 }
 0x156   :  { %v638_v17 = vrot.slane %v637_v15, 1  ;;  %v650_v18 = vrot.slane %v649_v16, 2 }
 0x158   :  { %v651_v19 = vadd.f32 %v650_v18, %v649_v16  ;;  %v639_v20 = vadd.f32 %v638_v17, %v637_v15 }
 0x15a   :  { %v652_v22 = vrot.slane %v651_v19, 1 }
 0x15c   :  { %v653_v23 = vadd.f32 %v652_v22, %v651_v19 }
 0x15e   :  { %v654_v24 = vadd.f32 %v653_v23, %v639_v20  ;;  %v660_v25 = vmul.f32 %v653_v23, %v639_v20 }
 0x160   :  { %v655_v27 = vmul.f32 0.5, %v654_v24  ;;  %v661_v28 = vsub.f32 %v660_v25, %v612_v62 }
 0x162   :  { %v656_v33 = vsub.f32 %v655_v27, %v606_v63  ;;  %v663_v34 = vmul.f32 %v662_v26, %v661_v28 }
 0x164   :  { %v657_v36 = vmul.f32 %v948_v30, %v656_v33  ;;  %v664_v31 = vadd.f32 %v663_v34, %v612_v62 }
 0x166   :  { %v658_v37 = vadd.f32 %v657_v36, %v606_v63  ;;  %v665_v38 = vsub.f32 %v1091_v29, %v664_v31  ;;  %v766_v36 = vstv %s957_s26  ;;  %s965_s26 = sld [smem:[#allocation5 + $0xf]] }
 0x168   :  { %v666_v40 = vmul.f32 %v665_v38, %v1096_v32  ;;  %v684_v35 = vmul.f32 %v951_v39, %v658_v37  ;;  %v693_v41 = vrot.slane %v658_v37, 4 }
 0x16a   :  { %v667_v42 = vmul.f32 %v666_v40, %v665_v38  ;;  %v685_v43 = vsel %vm59_vm0, %v684_v35, 0.0  ;;  %v695_v44 = vmul.f32 %v951_v39, %v693_v41  ;;  %v956_v38 = vld [vmem:[%s1287_s0 + $0xd8] sm:$0xf] }
 0x16b   :  { %v686_v45 = vrot.slane %v685_v43, 4 }
 0x16c   :  { %v668_v46 = vsel %vm95_vm1, %v667_v42, 0.0  ;;  %v697_v47 = vrot.slane %v695_v44, 4  ;;  %v959_v44 = vld [vmem:[%s1287_s0 + $0xe0] sm:$0xff] }
 0x16d   :  { %669 = vadd.xlane.f32.xlu2 %v668_v46  ;;  %v687_v21 = vadd.f32 %v686_v45, %v685_v43 }
 0x16e   :  { %v699_v48 = vsel %vm59_vm0, %v697_v47, 0.0 }
 0x16f   :  { %v688_v49 = vrot.slane %v687_v21, 2  ;;  %v700_v50 = vrot.slane %v699_v48, 4 }
 0x171   :  { %v689_v51 = vadd.f32 %v688_v49, %v687_v21  ;;  %v701_v52 = vadd.f32 %v700_v50, %v699_v48 }
 0x173   :  { %v690_v53 = vrot.slane %v689_v51, 1  ;;  %v702_v54 = vrot.slane %v701_v52, 2 }
 0x175   :  { %v703_v55 = vadd.f32 %v702_v54, %v701_v52  ;;  %v691_v56 = vadd.f32 %v690_v53, %v689_v51 }
 0x177   :  { %v704_v57 = vrot.slane %v703_v55, 1 }
 0x179   :  { %v705_v58 = vadd.f32 %v704_v57, %v703_v55 }
 0x17b   :  { %v706_v59 = vadd.f32 %v705_v58, %v691_v56  ;;  %v712_v60 = vmul.f32 %v705_v58, %v691_v56 }
 0x17d   :  { %v707_v62 = vmul.f32 0.5, %v706_v59  ;;  %v713_v63 = vsub.f32 %v712_v60, %v664_v31 }
 0x17f   :  { %v708_v1 = vsub.f32 %v707_v62, %v658_v37  ;;  %v715_v2 = vmul.f32 %v714_v61, %v713_v63 }
 0x181   :  { %v709_v3 = vmul.f32 %v952_v0, %v708_v1  ;;  %v716_v4 = vadd.f32 %v715_v2, %v664_v31 }
 0x183   :  { %v710_v5 = vadd.f32 %v709_v3, %v658_v37  ;;  %v717_v6 = vsub.f32 %v1091_v29, %v716_v4  ;;  %v818_v3 = vstv %s961_s8  ;;  %s896_s8 = sshll.u32 %s1294_s7, 4  ;;  %s897_s8 = int_to_ptr.hbm [resolvable:$true] %s896_s8 }
 0x185   :  { %v718_v8 = vmul.f32 %v717_v6, %v1096_v32  ;;  %v736_v9 = vmul.f32 %v955_v7, %v710_v5  ;;  %v745_v10 = vrot.slane %v710_v5, 4 }
 0x187   :  { %v719_v11 = vmul.f32 %v718_v8, %v717_v6  ;;  %v737_v12 = vsel %vm59_vm0, %v736_v9, 0.0  ;;  %v747_v13 = vmul.f32 %v955_v7, %v745_v10  ;;  %v960_v6 = vld [vmem:[%s1287_s0 + $0xe8] sm:$0xf] }
 0x188   :  { %v738_v14 = vrot.slane %v737_v12, 4 }
 0x189   :  { %v720_v15 = vsel %vm95_vm1, %v719_v11, 0.0  ;;  %v749_v16 = vrot.slane %v747_v13, 4  ;;  %v963_v13 = vld [vmem:[%s1287_s0 + $0xf0] sm:$0xff]  ;;  %s964_s0 = sld [smem:[#allocation2 + $0xf]] }
 0x18a   :  { %721 = vadd.xlane.f32.xlu0 %v720_v15  ;;  %v739_v17 = vadd.f32 %v738_v14, %v737_v12 }
 0x18b   :  { %v751_v18 = vsel %vm59_vm0, %v749_v16, 0.0 }
 0x18c   :  { %v740_v19 = vrot.slane %v739_v17, 2  ;;  %v752_v20 = vrot.slane %v751_v18, 4 }
 0x18e   :  { %v741_v22 = vadd.f32 %v740_v19, %v739_v17  ;;  %v753_v23 = vadd.f32 %v752_v20, %v751_v18 }
 0x190   :  { %v742_v24 = vrot.slane %v741_v22, 1  ;;  %v754_v25 = vrot.slane %v753_v23, 2 }
 0x192   :  { %v755_v26 = vadd.f32 %v754_v25, %v753_v23  ;;  %v743_v27 = vadd.f32 %v742_v24, %v741_v22 }
 0x194   :  { %v756_v28 = vrot.slane %v755_v26, 1 }
 0x196   :  { %v757_v30 = vadd.f32 %v756_v28, %v755_v26 }
 0x198   :  { %v758_v33 = vadd.f32 %v757_v30, %v743_v27  ;;  %v764_v34 = vmul.f32 %v757_v30, %v743_v27 }
 0x19a   :  { %v759_v31 = vmul.f32 0.5, %v758_v33  ;;  %v765_v37 = vsub.f32 %v764_v34, %v716_v4 }
 0x19c   :  { %v760_v39 = vsub.f32 %v759_v31, %v710_v5  ;;  %v767_v40 = vmul.f32 %v766_v36, %v765_v37 }
 0x19e   :  { %v761_v35 = vmul.f32 %v956_v38, %v760_v39  ;;  %v768_v41 = vadd.f32 %v767_v40, %v716_v4  ;;  %v864_v38 = vstv %s964_s0 }
 0x1a0   :  { %v762_v42 = vadd.f32 %v761_v35, %v710_v5  ;;  %v769_v43 = vsub.f32 %v1091_v29, %v768_v41 }
 0x1a2   :  { %v770_v45 = vmul.f32 %v769_v43, %v1096_v32  ;;  %v788_v46 = vmul.f32 %v959_v44, %v762_v42  ;;  %v797_v47 = vrot.slane %v762_v42, 4 }
 0x1a4   :  { %v771_v21 = vmul.f32 %v770_v45, %v769_v43  ;;  %v789_v48 = vsel %vm59_vm0, %v788_v46, 0.0  ;;  %v799_v49 = vmul.f32 %v959_v44, %v797_v47  ;;  %v970_v43 = vld [vmem:[%s1291_s4] sm:$0xff]  ;;  %v98_v47 = vpop.xlane.xlu0 %97  ;;  %s910_s4 = sld [smem:[#allocation5 + $0x1]] }
 0x1a5   :  { %v790_v50 = vrot.slane %v789_v48, 4 }
 0x1a6   :  { %v772_v51 = vsel %vm95_vm1, %v771_v21, 0.0  ;;  %v801_v52 = vrot.slane %v799_v49, 4  ;;  %v202_v21 = vpop.xlane.xlu1 %201  ;;  %v99_v49 = vrot.slane %v98_v47, 4 }
 0x1a7   :  { %773 = vadd.xlane.f32.xlu1 %v772_v51  ;;  %v791_v53 = vadd.f32 %v790_v50, %v789_v48 }
 0x1a8   :  { %v803_v54 = vsel %vm59_vm0, %v801_v52, 0.0  ;;  %v100_v51 = vadd.f32 %v99_v49, %v98_v47  ;;  %v203_v52 = vrot.slane %v202_v21, 4 }
 0x1a9   :  { %v792_v55 = vrot.slane %v791_v53, 2  ;;  %v804_v56 = vrot.slane %v803_v54, 4 }
 0x1ab   :  { %v793_v57 = vadd.f32 %v792_v55, %v791_v53  ;;  %v805_v58 = vadd.f32 %v804_v56, %v803_v54  ;;  %v306_v53 = vpop.xlane.xlu2 %305  ;;  %v101_v56 = vrot.slane %v100_v51, 2 }
 0x1ac   :  { %v150_v48 = vpop.xlane.xlu0 %149 }
 0x1ad   :  { %v794_v59 = vrot.slane %v793_v57, 1  ;;  %v806_v60 = vrot.slane %v805_v58, 2  ;;  %v151_v50 = vrot.slane %v150_v48, 4 }
 0x1ae   :  { %v254_v55 = vpop.xlane.xlu1 %253 }
 0x1af   :  { %v807_v61 = vadd.f32 %v806_v60, %v805_v58  ;;  %v795_v62 = vadd.f32 %v794_v59, %v793_v57  ;;  %v152_v54 = vadd.f32 %v151_v50, %v150_v48  ;;  %v204_v57 = vadd.f32 %v203_v52, %v202_v21 }
 0x1b0   :  { %v255_v59 = vrot.slane %v254_v55, 4  ;;  %v307_v60 = vrot.slane %v306_v53, 4  ;;  %v314_v21 = vstv %s922_s16  ;;  %v366_v48 = vstv %s1274_s17 }
 0x1b1   :  { %v808_v63 = vrot.slane %v807_v61, 1  ;;  %v153_v58 = vrot.slane %v152_v54, 2 }
 0x1b3   :  { %v809_v0 = vadd.f32 %v808_v63, %v807_v61  ;;  %v102_v61 = vadd.f32 %v101_v56, %v100_v51  ;;  %v154_v63 = vadd.f32 %v153_v58, %v152_v54  ;;  %v418_v58 = vstv %s1277_s2 }
 0x1b5   :  { %v810_v1 = vadd.f32 %v809_v0, %v795_v62  ;;  %v816_v2 = vmul.f32 %v809_v0, %v795_v62  ;;  %v205_v62 = vrot.slane %v204_v57, 2  ;;  %v256_v0 = vadd.f32 %v255_v59, %v254_v55 }
 0x1b7   :  { %v811_v4 = vmul.f32 0.5, %v810_v1  ;;  %v817_v5 = vsub.f32 %v816_v2, %v768_v41  ;;  %v358_v1 = vpop.xlane.xlu2 %357  ;;  %v308_v2 = vadd.f32 %v307_v60, %v306_v53 }
 0x1b9   :  { %v812_v7 = vsub.f32 %v811_v4, %v762_v42  ;;  %v819_v8 = vmul.f32 %v818_v3, %v817_v5  ;;  %v359_v3 = vrot.slane %v358_v1, 4  ;;  %v103_v4 = vrot.slane %v102_v61, 1 }
 0x1ba   :  { %v206_v5 = vadd.f32 %v205_v62, %v204_v57 }
 0x1bb   :  { %v813_v9 = vmul.f32 %v960_v6, %v812_v7  ;;  %v820_v10 = vadd.f32 %v819_v8, %v768_v41  ;;  %v969_v41 = vld [vmem:[%s1290_s3] sm:$0xff]  ;;  %s105_s3 = sld [smem:[#allocation5]]  ;;  %v155_v6 = vrot.slane %v154_v63, 1  ;;  %v257_v7 = vrot.slane %v256_v0, 2  ;;  %v410_v8 = vpop.xlane.xlu0 %409 }
 0x1bd   :  { %v821_v11 = vsub.f32 %v1091_v29, %v820_v10  ;;  %v814_v12 = vadd.f32 %v813_v9, %v762_v42  ;;  %v309_v9 = vrot.slane %v308_v2, 2 }
 0x1bf   :  { %v822_v14 = vmul.f32 %v821_v11, %v1096_v32  ;;  %v839_v15 = vmul.f32 %v963_v13, %v814_v12  ;;  %v848_v16 = vrot.slane %v814_v12, 4  ;;  %v104_v12 = vadd.f32 %v103_v4, %v102_v61 }
 0x1c1   :  { %v823_v17 = vmul.f32 %v822_v14, %v821_v11  ;;  %v840_v18 = vsel %vm59_vm0, %v839_v15, 0.0  ;;  %v850_v19 = vmul.f32 %v963_v13, %v848_v16  ;;  %v411_v11 = vrot.slane %v410_v8, 4 }
 0x1c2   :  { %v841_v20 = vrot.slane %v840_v18, 4  ;;  %v207_v13 = vrot.slane %v206_v5, 1  ;;  %v156_v14 = vadd.f32 %v155_v6, %v154_v63  ;;  %v258_v15 = vadd.f32 %v257_v7, %v256_v0 }
 0x1c3   :  { %v824_v22 = vsel %vm95_vm1, %v823_v17, 0.0  ;;  %v852_v23 = vrot.slane %v850_v19, 4  ;;  %v106_v16 = vstv %s105_s3  ;;  %v158_v17 = vstv %s910_s4 }
 0x1c4   :  { %825 = vadd.xlane.f32.xlu2 %v824_v22  ;;  %v842_v24 = vadd.f32 %v841_v20, %v840_v18  ;;  %v462_v18 = vpop.xlane.xlu1 %461  ;;  %v310_v19 = vadd.f32 %v309_v9, %v308_v2  ;;  %v412_v22 = vadd.f32 %v411_v11, %v410_v8  ;;  %v470_v6 = vstv %s1280_s18 }
 0x1c5   :  { %v854_v29 = vsel %vm59_vm0, %v852_v23, 0.0  ;;  %v463_v23 = vrot.slane %v462_v18, 4 }
 0x1c6   :  { %v843_v25 = vrot.slane %v842_v24, 2  ;;  %v855_v26 = vrot.slane %v854_v29, 4 }
 0x1c8   :  { %v844_v27 = vadd.f32 %v843_v25, %v842_v24  ;;  %v856_v28 = vadd.f32 %v855_v26, %v854_v29  ;;  %v107_v24 = vmul.f32 %v106_v16, %v104_v12  ;;  %v208_v29 = vadd.f32 %v207_v13, %v206_v5 }
 0x1c9   :  { %v159_v25 = vmul.f32 %v158_v17, %v156_v14  ;;  %v259_v26 = vrot.slane %v258_v15, 1  ;;  %v522_v16 = vstv %s938_s19 }
 0x1ca   :  { %v845_v30 = vrot.slane %v844_v27, 1  ;;  %v857_v32 = vrot.slane %v856_v28, 2 }
 0x1cc   :  { %v858_v33 = vadd.f32 %v857_v32, %v856_v28  ;;  %v846_v34 = vadd.f32 %v845_v30, %v844_v27  ;;  %v210_v27 = vstv %s914_s14  ;;  %v514_v28 = vpop.xlane.xlu2 %513  ;;  %v413_v32 = vrot.slane %v412_v22, 2  ;;  %v618_v53 = vpop.xlane.xlu1 %617 }
 0x1cd   :  { %v619_v57 = vrot.slane %v618_v53, 4 }
 0x1ce   :  { %v859_v36 = vrot.slane %v858_v33, 1 }
 0x1cf   :  { %v620_v2 = vadd.f32 %v619_v57, %v618_v53 }
 0x1d0   :  { %v860_v31 = vadd.f32 %v859_v36, %v858_v33  ;;  %v464_v33 = vadd.f32 %v463_v23, %v462_v18  ;;  %v211_v36 = vmul.f32 %v210_v27, %v208_v29 }
 0x1d1   :  { %v621_v11 = vrot.slane %v620_v2, 2 }
 0x1d2   :  { %v862_v37 = vmul.f32 %v860_v31, %v846_v34  ;;  %v515_v34 = vrot.slane %v514_v28, 4  ;;  %v311_v31 = vrot.slane %v310_v19, 1 }
 0x1d4   :  { %v863_v39 = vsub.f32 %v862_v37, %v820_v10  ;;  %v160_v37 = vadd.f32 %v159_v25, %v107_v24 }
 0x1d6   :  { %v865_v40 = vmul.f32 %v864_v38, %v863_v39  ;;  %v260_v38 = vadd.f32 %v259_v26, %v258_v15  ;;  %v262_v39 = vstv %s1272_s15 }
 0x1d8   :  { %v866_v35 = vadd.f32 %v865_v40, %v820_v10  ;;  %v360_v10 = vadd.f32 %v359_v3, %v358_v1 }
 0x1da   :  { %v867_v42 = vsub.f32 %v969_v41, %v866_v35  ;;  %v361_v20 = vrot.slane %v360_v10, 2  ;;  %v414_v35 = vadd.f32 %v413_v32, %v412_v22  ;;  %v465_v41 = vrot.slane %v464_v33, 2 }
 0x1db   :  { %v574_v32 = vstv %s942_s20 }
 0x1dc   :  { %v868_v44 = vmul.f32 %v970_v43, %v867_v42  ;;  %v362_v30 = vadd.f32 %v361_v20, %v360_v10  ;;  %v566_v43 = vpop.xlane.xlu0 %565  ;;  %v415_v50 = vrot.slane %v414_v35, 1  ;;  %v466_v51 = vadd.f32 %v465_v41, %v464_v33 }
 0x1dd   :  { %v567_v47 = vrot.slane %v566_v43, 4  ;;  %v622_v20 = vadd.f32 %v621_v11, %v620_v2 }
 0x1de   :  { %v869_v45 = vmul.f32 %v868_v44, %v867_v42  ;;  %v363_v40 = vrot.slane %v362_v30, 1  ;;  %v516_v42 = vadd.f32 %v515_v34, %v514_v28  ;;  %v312_v44 = vadd.f32 %v311_v31, %v310_v19 }
 0x1df   :  { %v568_v56 = vadd.f32 %v567_v47, %v566_v43  ;;  %v416_v60 = vadd.f32 %v415_v50, %v414_v35  ;;  %v467_v61 = vrot.slane %v466_v51, 1  ;;  %v623_v28 = vrot.slane %v622_v20, 1 }
 0x1e0   :  { %v870_v46 = vsel %vm95_vm1, %v869_v45, 0.0  ;;  %v212_v45 = vadd.f32 %v211_v36, %v160_v37  ;;  %v364_v49 = vadd.f32 %v363_v40, %v362_v30  ;;  %v517_v52 = vrot.slane %v516_v42, 2  ;;  %v670_v63 = vpop.xlane.xlu2 %669 }
 0x1e1   :  { %871 = vadd.xlane.f32.xlu0 %v870_v46  ;;  %v263_v46 = vmul.f32 %v262_v39, %v260_v38  ;;  %v315_v54 = vmul.f32 %v314_v21, %v312_v44  ;;  %v569_v1 = vrot.slane %v568_v56, 2  ;;  %v671_v3 = vrot.slane %v670_v63, 4 }
 0x1e2   :  { %v367_v59 = vmul.f32 %v366_v48, %v364_v49  ;;  %v518_v62 = vadd.f32 %v517_v52, %v516_v42  ;;  %v419_v5 = vmul.f32 %v418_v58, %v416_v60  ;;  %v468_v7 = vadd.f32 %v467_v61, %v466_v51 }
 0x1e3   :  { %v264_v55 = vadd.f32 %v263_v46, %v212_v45  ;;  %v570_v10 = vadd.f32 %v569_v1, %v568_v56  ;;  %v672_v12 = vadd.f32 %v671_v3, %v670_v63  ;;  %v624_v38 = vadd.f32 %v623_v28, %v622_v20 }
 0x1e4   :  { %v519_v8 = vrot.slane %v518_v62, 1  ;;  %v471_v15 = vmul.f32 %v470_v6, %v468_v7  ;;  %v626_v40 = vstv %s946_s21  ;;  %v678_v46 = vstv %s950_s22 }
 0x1e5   :  { %v316_v0 = vadd.f32 %v315_v54, %v264_v55  ;;  %v571_v19 = vrot.slane %v570_v10, 1  ;;  %v673_v22 = vrot.slane %v672_v12, 2  ;;  %v627_v44 = vmul.f32 %v626_v40, %v624_v38 }
 0x1e6   :  { %v520_v17 = vadd.f32 %v519_v8, %v518_v62  ;;  %v730_v54 = vstv %s954_s23  ;;  %v782_v61 = vstv %s958_s24  ;;  %v834_v3 = vstv %s962_s25 }
 0x1e7   :  { %v368_v9 = vadd.f32 %v367_v59, %v316_v0  ;;  %v572_v27 = vadd.f32 %v571_v19, %v570_v10  ;;  %v674_v30 = vadd.f32 %v673_v22, %v672_v12  ;;  %v880_v8 = vstv %s965_s26 }
 0x1e8   :  { %v523_v25 = vmul.f32 %v522_v16, %v520_v17 }
 0x1e9   :  { %v420_v18 = vadd.f32 %v419_v5, %v368_v9  ;;  %v575_v37 = vmul.f32 %v574_v32, %v572_v27  ;;  %v675_v39 = vrot.slane %v674_v30, 1 }
 0x1eb   :  { %v472_v26 = vadd.f32 %v471_v15, %v420_v18  ;;  %v676_v45 = vadd.f32 %v675_v39, %v674_v30 }
 0x1ed   :  { %v524_v31 = vadd.f32 %v523_v25, %v472_v26  ;;  %v679_v50 = vmul.f32 %v678_v46, %v676_v45 }
 0x1ef   :  { %v576_v43 = vadd.f32 %v575_v37, %v524_v31 }
 0x1f1   :  { %v628_v49 = vadd.f32 %v627_v44, %v576_v43 }
 0x1f3   :  { %v680_v55 = vadd.f32 %v679_v50, %v628_v49 }
 0x1fd   :  { %v722_v4 = vpop.xlane.xlu0 %721 }
 0x1fe   :  { %v723_v13 = vrot.slane %v722_v4, 4 }
 0x200   :  { %v724_v23 = vadd.f32 %v723_v13, %v722_v4 }
 0x202   :  { %v725_v33 = vrot.slane %v724_v23, 2 }
 0x204   :  { %v726_v35 = vadd.f32 %v725_v33, %v724_v23 }
 0x206   :  { %v727_v47 = vrot.slane %v726_v35, 1 }
 0x208   :  { %v728_v51 = vadd.f32 %v727_v47, %v726_v35 }
 0x20a   :  { %v731_v57 = vmul.f32 %v730_v54, %v728_v51 }
 0x20c   :  { %v732_v63 = vadd.f32 %v731_v57, %v680_v55 }
 0x21a   :  { %v774_v14 = vpop.xlane.xlu1 %773 }
 0x21b   :  { %v775_v24 = vrot.slane %v774_v14, 4 }
 0x21d   :  { %v776_v34 = vadd.f32 %v775_v24, %v774_v14 }
 0x21f   :  { %v777_v41 = vrot.slane %v776_v34, 2 }
 0x221   :  { %v778_v21 = vadd.f32 %v777_v41, %v776_v34 }
 0x223   :  { %v779_v52 = vrot.slane %v778_v21, 1 }
 0x225   :  { %v780_v58 = vadd.f32 %v779_v52, %v778_v21 }
 0x227   :  { %v783_v0 = vmul.f32 %v782_v61, %v780_v58 }
 0x229   :  { %v784_v5 = vadd.f32 %v783_v0, %v732_v63 }
 0x237   :  { %v826_v29 = vpop.xlane.xlu2 %825 }
 0x238   :  { %v827_v36 = vrot.slane %v826_v29, 4 }
 0x23a   :  { %v828_v42 = vadd.f32 %v827_v36, %v826_v29 }
 0x23c   :  { %v829_v48 = vrot.slane %v828_v42, 2 }
 0x23e   :  { %v830_v53 = vadd.f32 %v829_v48, %v828_v42 }
 0x240   :  { %v831_v59 = vrot.slane %v830_v53, 1 }
 0x242   :  { %v832_v1 = vadd.f32 %v831_v59, %v830_v53 }
 0x244   :  { %v835_v6 = vmul.f32 %v834_v3, %v832_v1 }
 0x246   :  { %v836_v10 = vadd.f32 %v835_v6, %v784_v5 }
 0x254   :  { %v872_v56 = vpop.xlane.xlu0 %871 }
 0x255   :  { %v873_v60 = vrot.slane %v872_v56, 4 }
 0x257   :  { %v874_v62 = vadd.f32 %v873_v60, %v872_v56 }
 0x259   :  { %v875_v2 = vrot.slane %v874_v62, 2 }
 0x25b   :  { %v876_v4 = vadd.f32 %v875_v2, %v874_v62 }
 0x25d   :  { %v877_v7 = vrot.slane %v876_v4, 1 }
 0x25f   :  { %v878_v9 = vadd.f32 %v877_v7, %v876_v4 }
 0x261   :  { %v881_v11 = vmul.f32 %v880_v8, %v878_v9  ;;  %v883_v13 = vmul.f32 0.2, %v878_v9 }
 0x263   :  { %v882_v12 = vadd.f32 %v881_v11, %v836_v10 }
 0x265   :  { %v884_v14 = vmul.f32 0.2, %v882_v12 }
 0x267   :  { %v885_v15 = vadd.f32 %v884_v14, %v883_v13 }
 0x269   :  { %v886_v16 = vadd.f32 4.0683594, %v885_v15 }
 0x26b   :  { %888 = vst.msk [vmem:[#allocation7] sm:$0x1] %vm887_vm2, %v886_v16 }
 0x26c   :  { %899 = dma.vmem_to_hbm [thread:$0]  %s895_s28, 16, %s897_s8, [#allocation3]  }
 0x26d   :  { %1023 = dma.done.wait [#allocation3], 16  }
 0x26e   :  { %1024 = vsyncadd [#allocation3], 4294967280 }
 0x26f   :  { %904 = vsyncpa [#allocation3], 1 }
 0x270   :  { %905 = vsyncpa [#allocation4], 1 }
 0x271   :  { %906 = vsyncpa [#allocation6], 1 }

</bundles_post_ra>
